<compile_context>
chip_gen: v6e
topology: v6e:2x2x1
jax: 0.10.0
libtpu: 0.0.40
codegen_flags: <defaults>
</compile_context>

<pallas_src>
import functools

import jax
import jax.numpy as jnp
import numpy as np
from jax import lax
from jax.experimental import pallas as pl
from jax.experimental.pallas import tpu as pltpu

SUB = 32           # threshold rows per inner sub-tile
LANE_CHUNK = 256   # sample lanes per inner chunk (multiple of 128)


def _round_up(x, m):
    return (x + m - 1) // m * m


def _pair_count_kernel(p_pos_ref, p_neg_ref, p_col_ref,
                       cpos_ref, cneg_ref, ceqn_ref, *, chunk):
    """Per-row pairwise counts for one row tile of thresholds.

    p_pos_ref: (1, n_lanes)  positives' scores, others/pad = NaN
    p_neg_ref: (1, n_lanes)  negatives' scores, others/pad = NaN
    p_col_ref: (row_blk, 1)  threshold scores (row tile)
    cpos/cneg/ceqn: (row_blk, 1) counts  #pos<p_i, #neg<p_i, #neg==p_i
    """
    n_lanes = p_pos_ref.shape[1]
    row_blk = p_col_ref.shape[0]
    n_chunks = n_lanes // chunk
    n_sub = row_blk // SUB

    def sub_tile(s, carry):
        r0 = pl.multiple_of(s * SUB, SUB)
        p_col = p_col_ref[pl.ds(r0, SUB), :]                    # (SUB, 1)
        # Hoisted lane-splat: reused by every chunk and all three compares.
        p_col_b = jnp.broadcast_to(p_col, (SUB, chunk))         # (SUB, chunk)

        def chunk_body(c, accs):
            acc_p, acc_n, acc_e = accs
            c0 = pl.multiple_of(c * chunk, chunk)
            # One sublane-splat per masked row per chunk (NaN -> compares false).
            pp = jnp.broadcast_to(p_pos_ref[:, pl.ds(c0, chunk)], (SUB, chunk))
            pn = jnp.broadcast_to(p_neg_ref[:, pl.ds(c0, chunk)], (SUB, chunk))
            gt_p = (p_col_b > pp).astype(jnp.float32)           # pos j with p_j < p_i
            gt_n = (p_col_b > pn).astype(jnp.float32)           # neg j with p_j < p_i
            eq_n = (p_col_b == pn).astype(jnp.float32)          # neg j with p_j == p_i
            acc_p = acc_p + jnp.sum(gt_p, axis=1, keepdims=True)
            acc_n = acc_n + jnp.sum(gt_n, axis=1, keepdims=True)
            acc_e = acc_e + jnp.sum(eq_n, axis=1, keepdims=True)
            return acc_p, acc_n, acc_e

        zero = jnp.zeros((SUB, 1), jnp.float32)
        acc_p, acc_n, acc_e = lax.fori_loop(0, n_chunks, chunk_body,
                                            (zero, zero, zero))
        cpos_ref[pl.ds(r0, SUB), :] = acc_p
        cneg_ref[pl.ds(r0, SUB), :] = acc_n
        ceqn_ref[pl.ds(r0, SUB), :] = acc_e
        return carry

    lax.fori_loop(0, n_sub, sub_tile, 0, unroll=True)


def auc_score_pallas(pred, label, *, row_blk=1024):
    """pred: (N,) float scores, label: (N,) binary labels. Returns (auc, ks)."""
    n = int(pred.shape[0])
    pred_f = jnp.asarray(pred, jnp.float32).reshape(n)
    label_f = jnp.asarray(label, jnp.float32).reshape(n)
    nan = jnp.float32(float("nan"))

    # ---- lane (sample j) axis: class-masked score rows, NaN mask & NaN pad ----
    lane_chunk = min(LANE_CHUNK, _round_up(n, 128))
    n_lanes = _round_up(n, lane_chunk)
    pad_l = n_lanes - n
    p_pos = jnp.where(label_f > 0.5, pred_f, nan)   # positives' scores
    p_neg = jnp.where(label_f > 0.5, nan, pred_f)   # negatives' scores
    p_pos_row = jnp.pad(p_pos, (0, pad_l), constant_values=float("nan")).reshape(1, n_lanes)
    p_neg_row = jnp.pad(p_neg, (0, pad_l), constant_values=float("nan")).reshape(1, n_lanes)

    # ---- row (threshold i) axis: padded with zeros (sliced away afterwards) ----
    row_blk = max(SUB, min(int(row_blk), _round_up(n, SUB)))
    row_blk = _round_up(row_blk, SUB)
    n_rows = _round_up(n, row_blk)
    pred_col = jnp.pad(pred_f, (0, n_rows - n)).reshape(n_rows, 1)

    grid = (n_rows // row_blk,)
    out_sds = jax.ShapeDtypeStruct((n_rows, 1), jnp.float32)
    col_spec = pl.BlockSpec((row_blk, 1), lambda i: (i, 0))
    row_spec = pl.BlockSpec((1, n_lanes), lambda i: (0, 0))

    cost = pl.CostEstimate(
        flops=8 * n_rows * n_lanes,
        transcendentals=0,
        bytes_accessed=4 * (2 * n_lanes + 4 * n_rows),
    )

    cnt_pos, cnt_neg, cnt_eqn = pl.pallas_call(
        functools.partial(_pair_count_kernel, chunk=lane_chunk),
        out_shape=(out_sds, out_sds, out_sds),
        grid=grid,
        in_specs=[row_spec, row_spec, col_spec],
        out_specs=(col_spec, col_spec, col_spec),
        compiler_params=pltpu.CompilerParams(
            dimension_semantics=("parallel",),       # independent row tiles
            vmem_limit_bytes=32 * 1024 * 1024,
        ),
        cost_estimate=cost,
    )(p_pos_row, p_neg_row, pred_col)

    cnt_pos = cnt_pos[:n, 0]
    cnt_neg = cnt_neg[:n, 0]
    cnt_eqn = cnt_eqn[:n, 0]

    n_pos = jnp.sum(label_f)
    n_neg = jnp.float32(n) - n_pos
    auc = jnp.sum(label_f * (cnt_neg + 0.5 * cnt_eqn)) / (n_pos * n_neg)
    diff = cnt_neg / n_neg - cnt_pos / n_pos       # tpr_i - fpr_i at threshold p_i
    ks = jnp.maximum(jnp.max(diff), jnp.float32(0.0))
    return auc, ks


def _reference_auc_ks(pred, label):
    """Pure numpy reference (matches sklearn roc_curve/auc semantics)."""
    pred = np.asarray(pred, np.float64)
    label = np.asarray(label, np.float64)
    pos = pred[label == 1]
    neg = pred[label == 0]
    gt = (pos[:, None] > neg[None, :]).astype(np.float64)
    eq = (pos[:, None] == neg[None, :]).astype(np.float64)
    auc = (gt + 0.5 * eq).mean()
    ge = pred[None, :] >= pred[:, None]
    tpr = (ge * (label == 1)[None, :]).sum(1) / (label == 1).sum()
    fpr = (ge * (label == 0)[None, :]).sum(1) / (label == 0).sum()
    ks = max(np.max(tpr - fpr), 0.0)
    return auc, ks


if __name__ == "__main__":
    N = 256  # number of samples
    key = jax.random.PRNGKey(0)
    k_pred, k_label = jax.random.split(key)
    pred = jax.random.uniform(k_pred, (N,), dtype=jnp.float32)
    # Quantize scores so ties exist (exercises the 0.5 * eq AUC term).
    pred = jnp.round(pred * 20.0) / 20.0
    label = (jax.random.uniform(k_label, (N,), dtype=jnp.float32) > 0.5).astype(
        jnp.float32
    )

    auc_val, ks_val = auc_score_pallas(pred, label)
    jax.block_until_ready((auc_val, ks_val))

    ref_auc, ref_ks = _reference_auc_ks(np.asarray(pred), np.asarray(label))
    assert np.allclose(float(auc_val), ref_auc, atol=1e-5), (float(auc_val), ref_auc)
    assert np.allclose(float(ks_val), ref_ks, atol=1e-5), (float(ks_val), ref_ks)

    print("KERNEL_OK")
</pallas_src>

<mosaic_0001>
module attributes {stable_mosaic.version = 11 : i64} {
  func.func @_pair_count_kernel(%arg0: i32, %arg1: memref<1x256xf32, #tpu.memory_space<vmem>>, %arg2: memref<1x256xf32, #tpu.memory_space<vmem>>, %arg3: memref<256x1xf32, #tpu.memory_space<vmem>>, %arg4: memref<256x1xf32, #tpu.memory_space<vmem>>, %arg5: memref<256x1xf32, #tpu.memory_space<vmem>>, %arg6: memref<256x1xf32, #tpu.memory_space<vmem>>) attributes {dimension_semantics = [#tpu.dimension_semantics<parallel>], iteration_bounds = array<i64: 1>, scalar_prefetch = 0 : i64, scratch_operands = 0 : i64, tpu.core_type = #tpu.core_type<tc>, window_params = [{pipeline_mode = #tpu.pipeline_mode<synchronous>, transform_indices = @transform_0, window_bounds = array<i64: 1, 256>}, {pipeline_mode = #tpu.pipeline_mode<synchronous>, transform_indices = @transform_1, window_bounds = array<i64: 1, 256>}, {transform_indices = @transform_2, window_bounds = array<i64: 256, 1>}, {transform_indices = @transform_3, window_bounds = array<i64: 256, 1>}, {transform_indices = @transform_4, window_bounds = array<i64: 256, 1>}, {transform_indices = @transform_5, window_bounds = array<i64: 256, 1>}]} {
    %c0_i32 = arith.constant 0 : i32
    %c32_i32 = arith.constant 32 : i32
    %0 = arith.muli %c0_i32, %c32_i32 : i32
    %1 = tpu.assume_multiple %0, 32 : i32
    %2 = arith.index_cast %1 : i32 to index
    %c0 = arith.constant 0 : index
    %3 = vector.load %arg3[%2, %c0] : memref<256x1xf32, #tpu.memory_space<vmem>>, vector<32x1xf32>
    %4 = vector.shape_cast %3 : vector<32x1xf32> to vector<32x1xf32>
    %5 = vector.broadcast %4 : vector<32x1xf32> to vector<32x256xf32>
    %cst = arith.constant 0.000000e+00 : f32
    %6 = vector.broadcast %cst : f32 to vector<32x1xf32>
    %c0_i32_0 = arith.constant 0 : i32
    %c256_i32 = arith.constant 256 : i32
    %7 = arith.muli %c0_i32_0, %c256_i32 : i32
    %8 = tpu.assume_multiple %7, 256 : i32
    %c0_1 = arith.constant 0 : index
    %9 = arith.index_cast %8 : i32 to index
    %10 = vector.load %arg1[%c0_1, %9] : memref<1x256xf32, #tpu.memory_space<vmem>>, vector<1x256xf32>
    %11 = vector.shape_cast %10 : vector<1x256xf32> to vector<1x256xf32>
    %12 = vector.broadcast %11 : vector<1x256xf32> to vector<32x256xf32>
    %c0_2 = arith.constant 0 : index
    %13 = arith.index_cast %8 : i32 to index
    %14 = vector.load %arg2[%c0_2, %13] : memref<1x256xf32, #tpu.memory_space<vmem>>, vector<1x256xf32>
    %15 = vector.shape_cast %14 : vector<1x256xf32> to vector<1x256xf32>
    %16 = vector.broadcast %15 : vector<1x256xf32> to vector<32x256xf32>
    %17 = arith.cmpf ogt, %5, %12 : vector<32x256xf32>
    %18 = arith.extui %17 : vector<32x256xi1> to vector<32x256xi32>
    %19 = arith.sitofp %18 : vector<32x256xi32> to vector<32x256xf32>
    %20 = arith.cmpf ogt, %5, %16 : vector<32x256xf32>
    %21 = arith.extui %20 : vector<32x256xi1> to vector<32x256xi32>
    %22 = arith.sitofp %21 : vector<32x256xi32> to vector<32x256xf32>
    %23 = arith.cmpf oeq, %5, %16 : vector<32x256xf32>
    %24 = arith.extui %23 : vector<32x256xi1> to vector<32x256xi32>
    %25 = arith.sitofp %24 : vector<32x256xi32> to vector<32x256xf32>
    %cst_3 = arith.constant dense<0.000000e+00> : vector<32xf32>
    %26 = vector.multi_reduction <add>, %19, %cst_3 [1] : vector<32x256xf32> to vector<32xf32>
    %27 = vector.shape_cast %26 : vector<32xf32> to vector<32x1xf32>
    %28 = arith.addf %6, %27 : vector<32x1xf32>
    %cst_4 = arith.constant dense<0.000000e+00> : vector<32xf32>
    %29 = vector.multi_reduction <add>, %22, %cst_4 [1] : vector<32x256xf32> to vector<32xf32>
    %30 = vector.shape_cast %29 : vector<32xf32> to vector<32x1xf32>
    %31 = arith.addf %6, %30 : vector<32x1xf32>
    %cst_5 = arith.constant dense<0.000000e+00> : vector<32xf32>
    %32 = vector.multi_reduction <add>, %25, %cst_5 [1] : vector<32x256xf32> to vector<32xf32>
    %33 = vector.shape_cast %32 : vector<32xf32> to vector<32x1xf32>
    %34 = arith.addf %6, %33 : vector<32x1xf32>
    %c1_i32 = arith.constant 1 : i32
    %35 = arith.index_cast %1 : i32 to index
    %c0_6 = arith.constant 0 : index
    %36 = vector.load %arg4[%35, %c0_6] : memref<256x1xf32, #tpu.memory_space<vmem>>, vector<32x1xf32>
    tpu.vector_store %arg4[%35, %c0_6], %28 {strides = array<i32>} : memref<256x1xf32, #tpu.memory_space<vmem>>, vector<32x1xf32>,
    %37 = arith.index_cast %1 : i32 to index
    %c0_7 = arith.constant 0 : index
    %38 = vector.load %arg5[%37, %c0_7] : memref<256x1xf32, #tpu.memory_space<vmem>>, vector<32x1xf32>
    tpu.vector_store %arg5[%37, %c0_7], %31 {strides = array<i32>} : memref<256x1xf32, #tpu.memory_space<vmem>>, vector<32x1xf32>,
    %39 = arith.index_cast %1 : i32 to index
    %c0_8 = arith.constant 0 : index
    %40 = vector.load %arg6[%39, %c0_8] : memref<256x1xf32, #tpu.memory_space<vmem>>, vector<32x1xf32>
    tpu.vector_store %arg6[%39, %c0_8], %34 {strides = array<i32>} : memref<256x1xf32, #tpu.memory_space<vmem>>, vector<32x1xf32>,
    %c1_i32_9 = arith.constant 1 : i32
    %c32_i32_10 = arith.constant 32 : i32
    %41 = arith.muli %c1_i32_9, %c32_i32_10 : i32
    %42 = tpu.assume_multiple %41, 32 : i32
    %43 = arith.index_cast %42 : i32 to index
    %c0_11 = arith.constant 0 : index
    %44 = vector.load %arg3[%43, %c0_11] : memref<256x1xf32, #tpu.memory_space<vmem>>, vector<32x1xf32>
    %45 = vector.shape_cast %44 : vector<32x1xf32> to vector<32x1xf32>
    %46 = vector.broadcast %45 : vector<32x1xf32> to vector<32x256xf32>
    %cst_12 = arith.constant 0.000000e+00 : f32
    %47 = vector.broadcast %cst_12 : f32 to vector<32x1xf32>
    %c0_i32_13 = arith.constant 0 : i32
    %c256_i32_14 = arith.constant 256 : i32
    %48 = arith.muli %c0_i32_13, %c256_i32_14 : i32
    %49 = tpu.assume_multiple %48, 256 : i32
    %c0_15 = arith.constant 0 : index
    %50 = arith.index_cast %49 : i32 to index
    %51 = vector.load %arg1[%c0_15, %50] : memref<1x256xf32, #tpu.memory_space<vmem>>, vector<1x256xf32>
    %52 = vector.shape_cast %51 : vector<1x256xf32> to vector<1x256xf32>
    %53 = vector.broadcast %52 : vector<1x256xf32> to vector<32x256xf32>
    %c0_16 = arith.constant 0 : index
    %54 = arith.index_cast %49 : i32 to index
    %55 = vector.load %arg2[%c0_16, %54] : memref<1x256xf32, #tpu.memory_space<vmem>>, vector<1x256xf32>
    %56 = vector.shape_cast %55 : vector<1x256xf32> to vector<1x256xf32>
    %57 = vector.broadcast %56 : vector<1x256xf32> to vector<32x256xf32>
    %58 = arith.cmpf ogt, %46, %53 : vector<32x256xf32>
    %59 = arith.extui %58 : vector<32x256xi1> to vector<32x256xi32>
    %60 = arith.sitofp %59 : vector<32x256xi32> to vector<32x256xf32>
    %61 = arith.cmpf ogt, %46, %57 : vector<32x256xf32>
    %62 = arith.extui %61 : vector<32x256xi1> to vector<32x256xi32>
    %63 = arith.sitofp %62 : vector<32x256xi32> to vector<32x256xf32>
    %64 = arith.cmpf oeq, %46, %57 : vector<32x256xf32>
    %65 = arith.extui %64 : vector<32x256xi1> to vector<32x256xi32>
    %66 = arith.sitofp %65 : vector<32x256xi32> to vector<32x256xf32>
    %cst_17 = arith.constant dense<0.000000e+00> : vector<32xf32>
    %67 = vector.multi_reduction <add>, %60, %cst_17 [1] : vector<32x256xf32> to vector<32xf32>
    %68 = vector.shape_cast %67 : vector<32xf32> to vector<32x1xf32>
    %69 = arith.addf %47, %68 : vector<32x1xf32>
    %cst_18 = arith.constant dense<0.000000e+00> : vector<32xf32>
    %70 = vector.multi_reduction <add>, %63, %cst_18 [1] : vector<32x256xf32> to vector<32xf32>
    %71 = vector.shape_cast %70 : vector<32xf32> to vector<32x1xf32>
    %72 = arith.addf %47, %71 : vector<32x1xf32>
    %cst_19 = arith.constant dense<0.000000e+00> : vector<32xf32>
    %73 = vector.multi_reduction <add>, %66, %cst_19 [1] : vector<32x256xf32> to vector<32xf32>
    %74 = vector.shape_cast %73 : vector<32xf32> to vector<32x1xf32>
    %75 = arith.addf %47, %74 : vector<32x1xf32>
    %c1_i32_20 = arith.constant 1 : i32
    %76 = arith.index_cast %42 : i32 to index
    %c0_21 = arith.constant 0 : index
    %77 = vector.load %arg4[%76, %c0_21] : memref<256x1xf32, #tpu.memory_space<vmem>>, vector<32x1xf32>
    tpu.vector_store %arg4[%76, %c0_21], %69 {strides = array<i32>} : memref<256x1xf32, #tpu.memory_space<vmem>>, vector<32x1xf32>,
    %78 = arith.index_cast %42 : i32 to index
    %c0_22 = arith.constant 0 : index
    %79 = vector.load %arg5[%78, %c0_22] : memref<256x1xf32, #tpu.memory_space<vmem>>, vector<32x1xf32>
    tpu.vector_store %arg5[%78, %c0_22], %72 {strides = array<i32>} : memref<256x1xf32, #tpu.memory_space<vmem>>, vector<32x1xf32>,
    %80 = arith.index_cast %42 : i32 to index
    %c0_23 = arith.constant 0 : index
    %81 = vector.load %arg6[%80, %c0_23] : memref<256x1xf32, #tpu.memory_space<vmem>>, vector<32x1xf32>
    tpu.vector_store %arg6[%80, %c0_23], %75 {strides = array<i32>} : memref<256x1xf32, #tpu.memory_space<vmem>>, vector<32x1xf32>,
    %c2_i32 = arith.constant 2 : i32
    %c32_i32_24 = arith.constant 32 : i32
    %82 = arith.muli %c2_i32, %c32_i32_24 : i32
    %83 = tpu.assume_multiple %82, 32 : i32
    %84 = arith.index_cast %83 : i32 to index
    %c0_25 = arith.constant 0 : index
    %85 = vector.load %arg3[%84, %c0_25] : memref<256x1xf32, #tpu.memory_space<vmem>>, vector<32x1xf32>
    %86 = vector.shape_cast %85 : vector<32x1xf32> to vector<32x1xf32>
    %87 = vector.broadcast %86 : vector<32x1xf32> to vector<32x256xf32>
    %cst_26 = arith.constant 0.000000e+00 : f32
    %88 = vector.broadcast %cst_26 : f32 to vector<32x1xf32>
    %c0_i32_27 = arith.constant 0 : i32
    %c256_i32_28 = arith.constant 256 : i32
    %89 = arith.muli %c0_i32_27, %c256_i32_28 : i32
    %90 = tpu.assume_multiple %89, 256 : i32
    %c0_29 = arith.constant 0 : index
    %91 = arith.index_cast %90 : i32 to index
    %92 = vector.load %arg1[%c0_29, %91] : memref<1x256xf32, #tpu.memory_space<vmem>>, vector<1x256xf32>
    %93 = vector.shape_cast %92 : vector<1x256xf32> to vector<1x256xf32>
    %94 = vector.broadcast %93 : vector<1x256xf32> to vector<32x256xf32>
    %c0_30 = arith.constant 0 : index
    %95 = arith.index_cast %90 : i32 to index
    %96 = vector.load %arg2[%c0_30, %95] : memref<1x256xf32, #tpu.memory_space<vmem>>, vector<1x256xf32>
    %97 = vector.shape_cast %96 : vector<1x256xf32> to vector<1x256xf32>
    %98 = vector.broadcast %97 : vector<1x256xf32> to vector<32x256xf32>
    %99 = arith.cmpf ogt, %87, %94 : vector<32x256xf32>
    %100 = arith.extui %99 : vector<32x256xi1> to vector<32x256xi32>
    %101 = arith.sitofp %100 : vector<32x256xi32> to vector<32x256xf32>
    %102 = arith.cmpf ogt, %87, %98 : vector<32x256xf32>
    %103 = arith.extui %102 : vector<32x256xi1> to vector<32x256xi32>
    %104 = arith.sitofp %103 : vector<32x256xi32> to vector<32x256xf32>
    %105 = arith.cmpf oeq, %87, %98 : vector<32x256xf32>
    %106 = arith.extui %105 : vector<32x256xi1> to vector<32x256xi32>
    %107 = arith.sitofp %106 : vector<32x256xi32> to vector<32x256xf32>
    %cst_31 = arith.constant dense<0.000000e+00> : vector<32xf32>
    %108 = vector.multi_reduction <add>, %101, %cst_31 [1] : vector<32x256xf32> to vector<32xf32>
    %109 = vector.shape_cast %108 : vector<32xf32> to vector<32x1xf32>
    %110 = arith.addf %88, %109 : vector<32x1xf32>
    %cst_32 = arith.constant dense<0.000000e+00> : vector<32xf32>
    %111 = vector.multi_reduction <add>, %104, %cst_32 [1] : vector<32x256xf32> to vector<32xf32>
    %112 = vector.shape_cast %111 : vector<32xf32> to vector<32x1xf32>
    %113 = arith.addf %88, %112 : vector<32x1xf32>
    %cst_33 = arith.constant dense<0.000000e+00> : vector<32xf32>
    %114 = vector.multi_reduction <add>, %107, %cst_33 [1] : vector<32x256xf32> to vector<32xf32>
    %115 = vector.shape_cast %114 : vector<32xf32> to vector<32x1xf32>
    %116 = arith.addf %88, %115 : vector<32x1xf32>
    %c1_i32_34 = arith.constant 1 : i32
    %117 = arith.index_cast %83 : i32 to index
    %c0_35 = arith.constant 0 : index
    %118 = vector.load %arg4[%117, %c0_35] : memref<256x1xf32, #tpu.memory_space<vmem>>, vector<32x1xf32>
    tpu.vector_store %arg4[%117, %c0_35], %110 {strides = array<i32>} : memref<256x1xf32, #tpu.memory_space<vmem>>, vector<32x1xf32>,
    %119 = arith.index_cast %83 : i32 to index
    %c0_36 = arith.constant 0 : index
    %120 = vector.load %arg5[%119, %c0_36] : memref<256x1xf32, #tpu.memory_space<vmem>>, vector<32x1xf32>
    tpu.vector_store %arg5[%119, %c0_36], %113 {strides = array<i32>} : memref<256x1xf32, #tpu.memory_space<vmem>>, vector<32x1xf32>,
    %121 = arith.index_cast %83 : i32 to index
    %c0_37 = arith.constant 0 : index
    %122 = vector.load %arg6[%121, %c0_37] : memref<256x1xf32, #tpu.memory_space<vmem>>, vector<32x1xf32>
    tpu.vector_store %arg6[%121, %c0_37], %116 {strides = array<i32>} : memref<256x1xf32, #tpu.memory_space<vmem>>, vector<32x1xf32>,
    %c3_i32 = arith.constant 3 : i32
    %c32_i32_38 = arith.constant 32 : i32
    %123 = arith.muli %c3_i32, %c32_i32_38 : i32
    %124 = tpu.assume_multiple %123, 32 : i32
    %125 = arith.index_cast %124 : i32 to index
    %c0_39 = arith.constant 0 : index
    %126 = vector.load %arg3[%125, %c0_39] : memref<256x1xf32, #tpu.memory_space<vmem>>, vector<32x1xf32>
    %127 = vector.shape_cast %126 : vector<32x1xf32> to vector<32x1xf32>
    %128 = vector.broadcast %127 : vector<32x1xf32> to vector<32x256xf32>
    %cst_40 = arith.constant 0.000000e+00 : f32
    %129 = vector.broadcast %cst_40 : f32 to vector<32x1xf32>
    %c0_i32_41 = arith.constant 0 : i32
    %c256_i32_42 = arith.constant 256 : i32
    %130 = arith.muli %c0_i32_41, %c256_i32_42 : i32
    %131 = tpu.assume_multiple %130, 256 : i32
    %c0_43 = arith.constant 0 : index
    %132 = arith.index_cast %131 : i32 to index
    %133 = vector.load %arg1[%c0_43, %132] : memref<1x256xf32, #tpu.memory_space<vmem>>, vector<1x256xf32>
    %134 = vector.shape_cast %133 : vector<1x256xf32> to vector<1x256xf32>
    %135 = vector.broadcast %134 : vector<1x256xf32> to vector<32x256xf32>
    %c0_44 = arith.constant 0 : index
    %136 = arith.index_cast %131 : i32 to index
    %137 = vector.load %arg2[%c0_44, %136] : memref<1x256xf32, #tpu.memory_space<vmem>>, vector<1x256xf32>
    %138 = vector.shape_cast %137 : vector<1x256xf32> to vector<1x256xf32>
    %139 = vector.broadcast %138 : vector<1x256xf32> to vector<32x256xf32>
    %140 = arith.cmpf ogt, %128, %135 : vector<32x256xf32>
    %141 = arith.extui %140 : vector<32x256xi1> to vector<32x256xi32>
    %142 = arith.sitofp %141 : vector<32x256xi32> to vector<32x256xf32>
    %143 = arith.cmpf ogt, %128, %139 : vector<32x256xf32>
    %144 = arith.extui %143 : vector<32x256xi1> to vector<32x256xi32>
    %145 = arith.sitofp %144 : vector<32x256xi32> to vector<32x256xf32>
    %146 = arith.cmpf oeq, %128, %139 : vector<32x256xf32>
    %147 = arith.extui %146 : vector<32x256xi1> to vector<32x256xi32>
    %148 = arith.sitofp %147 : vector<32x256xi32> to vector<32x256xf32>
    %cst_45 = arith.constant dense<0.000000e+00> : vector<32xf32>
    %149 = vector.multi_reduction <add>, %142, %cst_45 [1] : vector<32x256xf32> to vector<32xf32>
    %150 = vector.shape_cast %149 : vector<32xf32> to vector<32x1xf32>
    %151 = arith.addf %129, %150 : vector<32x1xf32>
    %cst_46 = arith.constant dense<0.000000e+00> : vector<32xf32>
    %152 = vector.multi_reduction <add>, %145, %cst_46 [1] : vector<32x256xf32> to vector<32xf32>
    %153 = vector.shape_cast %152 : vector<32xf32> to vector<32x1xf32>
    %154 = arith.addf %129, %153 : vector<32x1xf32>
    %cst_47 = arith.constant dense<0.000000e+00> : vector<32xf32>
    %155 = vector.multi_reduction <add>, %148, %cst_47 [1] : vector<32x256xf32> to vector<32xf32>
    %156 = vector.shape_cast %155 : vector<32xf32> to vector<32x1xf32>
    %157 = arith.addf %129, %156 : vector<32x1xf32>
    %c1_i32_48 = arith.constant 1 : i32
    %158 = arith.index_cast %124 : i32 to index
    %c0_49 = arith.constant 0 : index
    %159 = vector.load %arg4[%158, %c0_49] : memref<256x1xf32, #tpu.memory_space<vmem>>, vector<32x1xf32>
    tpu.vector_store %arg4[%158, %c0_49], %151 {strides = array<i32>} : memref<256x1xf32, #tpu.memory_space<vmem>>, vector<32x1xf32>,
    %160 = arith.index_cast %124 : i32 to index
    %c0_50 = arith.constant 0 : index
    %161 = vector.load %arg5[%160, %c0_50] : memref<256x1xf32, #tpu.memory_space<vmem>>, vector<32x1xf32>
    tpu.vector_store %arg5[%160, %c0_50], %154 {strides = array<i32>} : memref<256x1xf32, #tpu.memory_space<vmem>>, vector<32x1xf32>,
    %162 = arith.index_cast %124 : i32 to index
    %c0_51 = arith.constant 0 : index
    %163 = vector.load %arg6[%162, %c0_51] : memref<256x1xf32, #tpu.memory_space<vmem>>, vector<32x1xf32>
    tpu.vector_store %arg6[%162, %c0_51], %157 {strides = array<i32>} : memref<256x1xf32, #tpu.memory_space<vmem>>, vector<32x1xf32>,
    %c4_i32 = arith.constant 4 : i32
    %c32_i32_52 = arith.constant 32 : i32
    %164 = arith.muli %c4_i32, %c32_i32_52 : i32
    %165 = tpu.assume_multiple %164, 32 : i32
    %166 = arith.index_cast %165 : i32 to index
    %c0_53 = arith.constant 0 : index
    %167 = vector.load %arg3[%166, %c0_53] : memref<256x1xf32, #tpu.memory_space<vmem>>, vector<32x1xf32>
    %168 = vector.shape_cast %167 : vector<32x1xf32> to vector<32x1xf32>
    %169 = vector.broadcast %168 : vector<32x1xf32> to vector<32x256xf32>
    %cst_54 = arith.constant 0.000000e+00 : f32
    %170 = vector.broadcast %cst_54 : f32 to vector<32x1xf32>
    %c0_i32_55 = arith.constant 0 : i32
    %c256_i32_56 = arith.constant 256 : i32
    %171 = arith.muli %c0_i32_55, %c256_i32_56 : i32
    %172 = tpu.assume_multiple %171, 256 : i32
    %c0_57 = arith.constant 0 : index
    %173 = arith.index_cast %172 : i32 to index
    %174 = vector.load %arg1[%c0_57, %173] : memref<1x256xf32, #tpu.memory_space<vmem>>, vector<1x256xf32>
    %175 = vector.shape_cast %174 : vector<1x256xf32> to vector<1x256xf32>
    %176 = vector.broadcast %175 : vector<1x256xf32> to vector<32x256xf32>
    %c0_58 = arith.constant 0 : index
    %177 = arith.index_cast %172 : i32 to index
    %178 = vector.load %arg2[%c0_58, %177] : memref<1x256xf32, #tpu.memory_space<vmem>>, vector<1x256xf32>
    %179 = vector.shape_cast %178 : vector<1x256xf32> to vector<1x256xf32>
    %180 = vector.broadcast %179 : vector<1x256xf32> to vector<32x256xf32>
    %181 = arith.cmpf ogt, %169, %176 : vector<32x256xf32>
    %182 = arith.extui %181 : vector<32x256xi1> to vector<32x256xi32>
    %183 = arith.sitofp %182 : vector<32x256xi32> to vector<32x256xf32>
    %184 = arith.cmpf ogt, %169, %180 : vector<32x256xf32>
    %185 = arith.extui %184 : vector<32x256xi1> to vector<32x256xi32>
    %186 = arith.sitofp %185 : vector<32x256xi32> to vector<32x256xf32>
    %187 = arith.cmpf oeq, %169, %180 : vector<32x256xf32>
    %188 = arith.extui %187 : vector<32x256xi1> to vector<32x256xi32>
    %189 = arith.sitofp %188 : vector<32x256xi32> to vector<32x256xf32>
    %cst_59 = arith.constant dense<0.000000e+00> : vector<32xf32>
    %190 = vector.multi_reduction <add>, %183, %cst_59 [1] : vector<32x256xf32> to vector<32xf32>
    %191 = vector.shape_cast %190 : vector<32xf32> to vector<32x1xf32>
    %192 = arith.addf %170, %191 : vector<32x1xf32>
    %cst_60 = arith.constant dense<0.000000e+00> : vector<32xf32>
    %193 = vector.multi_reduction <add>, %186, %cst_60 [1] : vector<32x256xf32> to vector<32xf32>
    %194 = vector.shape_cast %193 : vector<32xf32> to vector<32x1xf32>
    %195 = arith.addf %170, %194 : vector<32x1xf32>
    %cst_61 = arith.constant dense<0.000000e+00> : vector<32xf32>
    %196 = vector.multi_reduction <add>, %189, %cst_61 [1] : vector<32x256xf32> to vector<32xf32>
    %197 = vector.shape_cast %196 : vector<32xf32> to vector<32x1xf32>
    %198 = arith.addf %170, %197 : vector<32x1xf32>
    %c1_i32_62 = arith.constant 1 : i32
    %199 = arith.index_cast %165 : i32 to index
    %c0_63 = arith.constant 0 : index
    %200 = vector.load %arg4[%199, %c0_63] : memref<256x1xf32, #tpu.memory_space<vmem>>, vector<32x1xf32>
    tpu.vector_store %arg4[%199, %c0_63], %192 {strides = array<i32>} : memref<256x1xf32, #tpu.memory_space<vmem>>, vector<32x1xf32>,
    %201 = arith.index_cast %165 : i32 to index
    %c0_64 = arith.constant 0 : index
    %202 = vector.load %arg5[%201, %c0_64] : memref<256x1xf32, #tpu.memory_space<vmem>>, vector<32x1xf32>
    tpu.vector_store %arg5[%201, %c0_64], %195 {strides = array<i32>} : memref<256x1xf32, #tpu.memory_space<vmem>>, vector<32x1xf32>,
    %203 = arith.index_cast %165 : i32 to index
    %c0_65 = arith.constant 0 : index
    %204 = vector.load %arg6[%203, %c0_65] : memref<256x1xf32, #tpu.memory_space<vmem>>, vector<32x1xf32>
    tpu.vector_store %arg6[%203, %c0_65], %198 {strides = array<i32>} : memref<256x1xf32, #tpu.memory_space<vmem>>, vector<32x1xf32>,
    %c5_i32 = arith.constant 5 : i32
    %c32_i32_66 = arith.constant 32 : i32
    %205 = arith.muli %c5_i32, %c32_i32_66 : i32
    %206 = tpu.assume_multiple %205, 32 : i32
    %207 = arith.index_cast %206 : i32 to index
    %c0_67 = arith.constant 0 : index
    %208 = vector.load %arg3[%207, %c0_67] : memref<256x1xf32, #tpu.memory_space<vmem>>, vector<32x1xf32>
    %209 = vector.shape_cast %208 : vector<32x1xf32> to vector<32x1xf32>
    %210 = vector.broadcast %209 : vector<32x1xf32> to vector<32x256xf32>
    %cst_68 = arith.constant 0.000000e+00 : f32
    %211 = vector.broadcast %cst_68 : f32 to vector<32x1xf32>
    %c0_i32_69 = arith.constant 0 : i32
    %c256_i32_70 = arith.constant 256 : i32
    %212 = arith.muli %c0_i32_69, %c256_i32_70 : i32
    %213 = tpu.assume_multiple %212, 256 : i32
    %c0_71 = arith.constant 0 : index
    %214 = arith.index_cast %213 : i32 to index
    %215 = vector.load %arg1[%c0_71, %214] : memref<1x256xf32, #tpu.memory_space<vmem>>, vector<1x256xf32>
    %216 = vector.shape_cast %215 : vector<1x256xf32> to vector<1x256xf32>
    %217 = vector.broadcast %216 : vector<1x256xf32> to vector<32x256xf32>
    %c0_72 = arith.constant 0 : index
    %218 = arith.index_cast %213 : i32 to index
    %219 = vector.load %arg2[%c0_72, %218] : memref<1x256xf32, #tpu.memory_space<vmem>>, vector<1x256xf32>
    %220 = vector.shape_cast %219 : vector<1x256xf32> to vector<1x256xf32>
    %221 = vector.broadcast %220 : vector<1x256xf32> to vector<32x256xf32>
    %222 = arith.cmpf ogt, %210, %217 : vector<32x256xf32>
    %223 = arith.extui %222 : vector<32x256xi1> to vector<32x256xi32>
    %224 = arith.sitofp %223 : vector<32x256xi32> to vector<32x256xf32>
    %225 = arith.cmpf ogt, %210, %221 : vector<32x256xf32>
    %226 = arith.extui %225 : vector<32x256xi1> to vector<32x256xi32>
    %227 = arith.sitofp %226 : vector<32x256xi32> to vector<32x256xf32>
    %228 = arith.cmpf oeq, %210, %221 : vector<32x256xf32>
    %229 = arith.extui %228 : vector<32x256xi1> to vector<32x256xi32>
    %230 = arith.sitofp %229 : vector<32x256xi32> to vector<32x256xf32>
    %cst_73 = arith.constant dense<0.000000e+00> : vector<32xf32>
    %231 = vector.multi_reduction <add>, %224, %cst_73 [1] : vector<32x256xf32> to vector<32xf32>
    %232 = vector.shape_cast %231 : vector<32xf32> to vector<32x1xf32>
    %233 = arith.addf %211, %232 : vector<32x1xf32>
    %cst_74 = arith.constant dense<0.000000e+00> : vector<32xf32>
    %234 = vector.multi_reduction <add>, %227, %cst_74 [1] : vector<32x256xf32> to vector<32xf32>
    %235 = vector.shape_cast %234 : vector<32xf32> to vector<32x1xf32>
    %236 = arith.addf %211, %235 : vector<32x1xf32>
    %cst_75 = arith.constant dense<0.000000e+00> : vector<32xf32>
    %237 = vector.multi_reduction <add>, %230, %cst_75 [1] : vector<32x256xf32> to vector<32xf32>
    %238 = vector.shape_cast %237 : vector<32xf32> to vector<32x1xf32>
    %239 = arith.addf %211, %238 : vector<32x1xf32>
    %c1_i32_76 = arith.constant 1 : i32
    %240 = arith.index_cast %206 : i32 to index
    %c0_77 = arith.constant 0 : index
    %241 = vector.load %arg4[%240, %c0_77] : memref<256x1xf32, #tpu.memory_space<vmem>>, vector<32x1xf32>
    tpu.vector_store %arg4[%240, %c0_77], %233 {strides = array<i32>} : memref<256x1xf32, #tpu.memory_space<vmem>>, vector<32x1xf32>,
    %242 = arith.index_cast %206 : i32 to index
    %c0_78 = arith.constant 0 : index
    %243 = vector.load %arg5[%242, %c0_78] : memref<256x1xf32, #tpu.memory_space<vmem>>, vector<32x1xf32>
    tpu.vector_store %arg5[%242, %c0_78], %236 {strides = array<i32>} : memref<256x1xf32, #tpu.memory_space<vmem>>, vector<32x1xf32>,
    %244 = arith.index_cast %206 : i32 to index
    %c0_79 = arith.constant 0 : index
    %245 = vector.load %arg6[%244, %c0_79] : memref<256x1xf32, #tpu.memory_space<vmem>>, vector<32x1xf32>
    tpu.vector_store %arg6[%244, %c0_79], %239 {strides = array<i32>} : memref<256x1xf32, #tpu.memory_space<vmem>>, vector<32x1xf32>,
    %c6_i32 = arith.constant 6 : i32
    %c32_i32_80 = arith.constant 32 : i32
    %246 = arith.muli %c6_i32, %c32_i32_80 : i32
    %247 = tpu.assume_multiple %246, 32 : i32
    %248 = arith.index_cast %247 : i32 to index
    %c0_81 = arith.constant 0 : index
    %249 = vector.load %arg3[%248, %c0_81] : memref<256x1xf32, #tpu.memory_space<vmem>>, vector<32x1xf32>
    %250 = vector.shape_cast %249 : vector<32x1xf32> to vector<32x1xf32>
    %251 = vector.broadcast %250 : vector<32x1xf32> to vector<32x256xf32>
    %cst_82 = arith.constant 0.000000e+00 : f32
    %252 = vector.broadcast %cst_82 : f32 to vector<32x1xf32>
    %c0_i32_83 = arith.constant 0 : i32
    %c256_i32_84 = arith.constant 256 : i32
    %253 = arith.muli %c0_i32_83, %c256_i32_84 : i32
    %254 = tpu.assume_multiple %253, 256 : i32
    %c0_85 = arith.constant 0 : index
    %255 = arith.index_cast %254 : i32 to index
    %256 = vector.load %arg1[%c0_85, %255] : memref<1x256xf32, #tpu.memory_space<vmem>>, vector<1x256xf32>
    %257 = vector.shape_cast %256 : vector<1x256xf32> to vector<1x256xf32>
    %258 = vector.broadcast %257 : vector<1x256xf32> to vector<32x256xf32>
    %c0_86 = arith.constant 0 : index
    %259 = arith.index_cast %254 : i32 to index
    %260 = vector.load %arg2[%c0_86, %259] : memref<1x256xf32, #tpu.memory_space<vmem>>, vector<1x256xf32>
    %261 = vector.shape_cast %260 : vector<1x256xf32> to vector<1x256xf32>
    %262 = vector.broadcast %261 : vector<1x256xf32> to vector<32x256xf32>
    %263 = arith.cmpf ogt, %251, %258 : vector<32x256xf32>
    %264 = arith.extui %263 : vector<32x256xi1> to vector<32x256xi32>
    %265 = arith.sitofp %264 : vector<32x256xi32> to vector<32x256xf32>
    %266 = arith.cmpf ogt, %251, %262 : vector<32x256xf32>
    %267 = arith.extui %266 : vector<32x256xi1> to vector<32x256xi32>
    %268 = arith.sitofp %267 : vector<32x256xi32> to vector<32x256xf32>
    %269 = arith.cmpf oeq, %251, %262 : vector<32x256xf32>
    %270 = arith.extui %269 : vector<32x256xi1> to vector<32x256xi32>
    %271 = arith.sitofp %270 : vector<32x256xi32> to vector<32x256xf32>
    %cst_87 = arith.constant dense<0.000000e+00> : vector<32xf32>
    %272 = vector.multi_reduction <add>, %265, %cst_87 [1] : vector<32x256xf32> to vector<32xf32>
    %273 = vector.shape_cast %272 : vector<32xf32> to vector<32x1xf32>
    %274 = arith.addf %252, %273 : vector<32x1xf32>
    %cst_88 = arith.constant dense<0.000000e+00> : vector<32xf32>
    %275 = vector.multi_reduction <add>, %268, %cst_88 [1] : vector<32x256xf32> to vector<32xf32>
    %276 = vector.shape_cast %275 : vector<32xf32> to vector<32x1xf32>
    %277 = arith.addf %252, %276 : vector<32x1xf32>
    %cst_89 = arith.constant dense<0.000000e+00> : vector<32xf32>
    %278 = vector.multi_reduction <add>, %271, %cst_89 [1] : vector<32x256xf32> to vector<32xf32>
    %279 = vector.shape_cast %278 : vector<32xf32> to vector<32x1xf32>
    %280 = arith.addf %252, %279 : vector<32x1xf32>
    %c1_i32_90 = arith.constant 1 : i32
    %281 = arith.index_cast %247 : i32 to index
    %c0_91 = arith.constant 0 : index
    %282 = vector.load %arg4[%281, %c0_91] : memref<256x1xf32, #tpu.memory_space<vmem>>, vector<32x1xf32>
    tpu.vector_store %arg4[%281, %c0_91], %274 {strides = array<i32>} : memref<256x1xf32, #tpu.memory_space<vmem>>, vector<32x1xf32>,
    %283 = arith.index_cast %247 : i32 to index
    %c0_92 = arith.constant 0 : index
    %284 = vector.load %arg5[%283, %c0_92] : memref<256x1xf32, #tpu.memory_space<vmem>>, vector<32x1xf32>
    tpu.vector_store %arg5[%283, %c0_92], %277 {strides = array<i32>} : memref<256x1xf32, #tpu.memory_space<vmem>>, vector<32x1xf32>,
    %285 = arith.index_cast %247 : i32 to index
    %c0_93 = arith.constant 0 : index
    %286 = vector.load %arg6[%285, %c0_93] : memref<256x1xf32, #tpu.memory_space<vmem>>, vector<32x1xf32>
    tpu.vector_store %arg6[%285, %c0_93], %280 {strides = array<i32>} : memref<256x1xf32, #tpu.memory_space<vmem>>, vector<32x1xf32>,
    %c7_i32 = arith.constant 7 : i32
    %c32_i32_94 = arith.constant 32 : i32
    %287 = arith.muli %c7_i32, %c32_i32_94 : i32
    %288 = tpu.assume_multiple %287, 32 : i32
    %289 = arith.index_cast %288 : i32 to index
    %c0_95 = arith.constant 0 : index
    %290 = vector.load %arg3[%289, %c0_95] : memref<256x1xf32, #tpu.memory_space<vmem>>, vector<32x1xf32>
    %291 = vector.shape_cast %290 : vector<32x1xf32> to vector<32x1xf32>
    %292 = vector.broadcast %291 : vector<32x1xf32> to vector<32x256xf32>
    %cst_96 = arith.constant 0.000000e+00 : f32
    %293 = vector.broadcast %cst_96 : f32 to vector<32x1xf32>
    %c0_i32_97 = arith.constant 0 : i32
    %c256_i32_98 = arith.constant 256 : i32
    %294 = arith.muli %c0_i32_97, %c256_i32_98 : i32
    %295 = tpu.assume_multiple %294, 256 : i32
    %c0_99 = arith.constant 0 : index
    %296 = arith.index_cast %295 : i32 to index
    %297 = vector.load %arg1[%c0_99, %296] : memref<1x256xf32, #tpu.memory_space<vmem>>, vector<1x256xf32>
    %298 = vector.shape_cast %297 : vector<1x256xf32> to vector<1x256xf32>
    %299 = vector.broadcast %298 : vector<1x256xf32> to vector<32x256xf32>
    %c0_100 = arith.constant 0 : index
    %300 = arith.index_cast %295 : i32 to index
    %301 = vector.load %arg2[%c0_100, %300] : memref<1x256xf32, #tpu.memory_space<vmem>>, vector<1x256xf32>
    %302 = vector.shape_cast %301 : vector<1x256xf32> to vector<1x256xf32>
    %303 = vector.broadcast %302 : vector<1x256xf32> to vector<32x256xf32>
    %304 = arith.cmpf ogt, %292, %299 : vector<32x256xf32>
    %305 = arith.extui %304 : vector<32x256xi1> to vector<32x256xi32>
    %306 = arith.sitofp %305 : vector<32x256xi32> to vector<32x256xf32>
    %307 = arith.cmpf ogt, %292, %303 : vector<32x256xf32>
    %308 = arith.extui %307 : vector<32x256xi1> to vector<32x256xi32>
    %309 = arith.sitofp %308 : vector<32x256xi32> to vector<32x256xf32>
    %310 = arith.cmpf oeq, %292, %303 : vector<32x256xf32>
    %311 = arith.extui %310 : vector<32x256xi1> to vector<32x256xi32>
    %312 = arith.sitofp %311 : vector<32x256xi32> to vector<32x256xf32>
    %cst_101 = arith.constant dense<0.000000e+00> : vector<32xf32>
    %313 = vector.multi_reduction <add>, %306, %cst_101 [1] : vector<32x256xf32> to vector<32xf32>
    %314 = vector.shape_cast %313 : vector<32xf32> to vector<32x1xf32>
    %315 = arith.addf %293, %314 : vector<32x1xf32>
    %cst_102 = arith.constant dense<0.000000e+00> : vector<32xf32>
    %316 = vector.multi_reduction <add>, %309, %cst_102 [1] : vector<32x256xf32> to vector<32xf32>
    %317 = vector.shape_cast %316 : vector<32xf32> to vector<32x1xf32>
    %318 = arith.addf %293, %317 : vector<32x1xf32>
    %cst_103 = arith.constant dense<0.000000e+00> : vector<32xf32>
    %319 = vector.multi_reduction <add>, %312, %cst_103 [1] : vector<32x256xf32> to vector<32xf32>
    %320 = vector.shape_cast %319 : vector<32xf32> to vector<32x1xf32>
    %321 = arith.addf %293, %320 : vector<32x1xf32>
    %c1_i32_104 = arith.constant 1 : i32
    %322 = arith.index_cast %288 : i32 to index
    %c0_105 = arith.constant 0 : index
    %323 = vector.load %arg4[%322, %c0_105] : memref<256x1xf32, #tpu.memory_space<vmem>>, vector<32x1xf32>
    tpu.vector_store %arg4[%322, %c0_105], %315 {strides = array<i32>} : memref<256x1xf32, #tpu.memory_space<vmem>>, vector<32x1xf32>,
    %324 = arith.index_cast %288 : i32 to index
    %c0_106 = arith.constant 0 : index
    %325 = vector.load %arg5[%324, %c0_106] : memref<256x1xf32, #tpu.memory_space<vmem>>, vector<32x1xf32>
    tpu.vector_store %arg5[%324, %c0_106], %318 {strides = array<i32>} : memref<256x1xf32, #tpu.memory_space<vmem>>, vector<32x1xf32>,
    %326 = arith.index_cast %288 : i32 to index
    %c0_107 = arith.constant 0 : index
    %327 = vector.load %arg6[%326, %c0_107] : memref<256x1xf32, #tpu.memory_space<vmem>>, vector<32x1xf32>
    tpu.vector_store %arg6[%326, %c0_107], %321 {strides = array<i32>} : memref<256x1xf32, #tpu.memory_space<vmem>>, vector<32x1xf32>,
    %c8_i32 = arith.constant 8 : i32
    return
  }
  func.func @transform_0(%arg0: i32) -> (i32, i32) {
    %c0_i32 = arith.constant 0 : i32
    %c0_i32_0 = arith.constant 0 : i32
    %c0_i32_1 = arith.constant 0 : i32
    return %c0_i32, %c0_i32_0 : i32, i32
  }
  func.func @transform_1(%arg0: i32) -> (i32, i32) {
    %c0_i32 = arith.constant 0 : i32
    %c0_i32_0 = arith.constant 0 : i32
    %c0_i32_1 = arith.constant 0 : i32
    return %c0_i32, %c0_i32_0 : i32, i32
  }
  func.func @transform_2(%arg0: i32) -> (i32, i32) {
    %c0_i32 = arith.constant 0 : i32
    %c0_i32_0 = arith.constant 0 : i32
    return %arg0, %c0_i32 : i32, i32
  }
  func.func @transform_3(%arg0: i32) -> (i32, i32) {
    %c0_i32 = arith.constant 0 : i32
    %c0_i32_0 = arith.constant 0 : i32
    return %arg0, %c0_i32 : i32, i32
  }
  func.func @transform_4(%arg0: i32) -> (i32, i32) {
    %c0_i32 = arith.constant 0 : i32
    %c0_i32_0 = arith.constant 0 : i32
    return %arg0, %c0_i32 : i32, i32
  }
  func.func @transform_5(%arg0: i32) -> (i32, i32) {
    %c0_i32 = arith.constant 0 : i32
    %c0_i32_0 = arith.constant 0 : i32
    return %arg0, %c0_i32 : i32, i32
  }
}

</mosaic_0001>

<bundles_post_ra>
// kernel: tpu_custom_call.1
= control target key start
LH: loop header
LB: loop body
LE: loop exit
PB: predicated region body
PF: predicated region fallthrough
CT: control target
= control target key end

     0   :  { %v1806_v0 = vmov 0   ;;  %v43_v9 = vlaneseq  ;;  %v1807_v21 = vmov 0.0   ;;  %s2855_s2 = inlined_call_operand.vmem [shape: f32[256,1], index: 2, kind: input, shape index: {}]   ;;  %s2856_s0 = inlined_call_operand.vmem [shape: f32[1,256], index: 0, kind: input, shape index: {}]   ;;  %s2857_s1 = inlined_call_operand.vmem [shape: f32[1,256], index: 1, kind: input, shape index: {}]   ;;  %s2858_s3 = inlined_call_operand.vmem [shape: f32[256,1], index: 3, kind: output, shape index: {0}]   ;;  %s2859_s4 = inlined_call_operand.vmem [shape: f32[256,1], index: 4, kind: output, shape index: {1}]   ;;  %s2860_s5 = inlined_call_operand.vmem [shape: f32[256,1], index: 5, kind: output, shape index: {2}]  }
   0x1   :  { %1805 = vset.pattern.permute.xlu1 %v1806_v0  ;;  %1804 = vset.pattern.permute.xlu0 %v1806_v0  ;;  %v19_v1 = vld [vmem:[%s2855_s2 + $0x10] sm:$0xff]  ;;  %v17_v2 = vld [vmem:[%s2855_s2] sm:$0xff]  ;;  %v20_v3 = vld [vmem:[%s2855_s2 + $0x18] sm:$0xff] }
   0x2   :  { %33 = vperm.xlu1 %1805, %v19_v1   ;;  %23 = vperm.xlu0 %1804, %v17_v2   ;;  %v18_v4 = vld [vmem:[%s2855_s2 + $0x8] sm:$0xff]  ;;  %v1522_v5 = vld [vmem:[%s2855_s2 + $0x20] sm:$0xff]  ;;  %v1524_v7 = vld [vmem:[%s2855_s2 + $0x30] sm:$0xff]  ;;  %v44_v10 = vshrl.u32 %v43_v9, 7 }
   0x3   :  { %v1523_v6 = vld [vmem:[%s2855_s2 + $0x28] sm:$0xff]  ;;  %v1525_v8 = vld [vmem:[%s2855_s2 + $0x38] sm:$0xff]  ;;  %v41_v13 = vld [vmem:[%s2856_s0] sm:$0x3] }
   0x4   :  { %v1862_v11 = vsub.s32 0, %v44_v10  ;;  %v1864_v12 = vsub.s32 1, %v44_v10  ;;  %v53_v16 = vld [vmem:[%s2857_s1] sm:$0x3] }
   0x5   :  { %v223_v40 = vld [vmem:[%s2856_s0] sm:$0x3] }
   0x6   :  { %38 = vperm.xlu1 %1805, %v20_v3   ;;  %28 = vperm.xlu0 %1804, %v18_v4   ;;  %v46_v14 = vrot.slane %v41_v13, %v1862_v11  ;;  %v50_v15 = vrot.slane %v41_v13, %v1864_v12  ;;  %v1877_v19 = vrot.slane %v53_v16, %v1862_v11  ;;  %v235_v49 = vld [vmem:[%s2857_s1] sm:$0x3] }
   0x7   :  { %v1880_v20 = vrot.slane %v53_v16, %v1864_v12  ;;  %v1920_v44 = vrot.slane %v223_v40, %v1862_v11  ;;  %v1924_v48 = vrot.slane %v223_v40, %v1864_v12  ;;  %v1941_v55 = vrot.slane %v235_v49, %v1862_v11 }
   0x8   :  { %v1945_v59 = vrot.slane %v235_v49, %v1864_v12 }
   0xa   :  { %205 = vperm.xlu1 %1805, %v1522_v5   ;;  %210 = vperm.xlu0 %1804, %v1523_v6  }
   0xe   :  { %215 = vperm.xlu1 %1805, %v1524_v7  }
  0x12   :  { %220 = vperm.xlu1 %1805, %v1525_v8  }
  0x7d   :  { %v1874_v17 = vpop.permute.xlu1 %33  ;;  %v24_v18 = vpop.permute.xlu0 %23 }
  0x7e   :  { %vm65_vm0 = vcmp.gt.f32.partialorder %v24_v18, %v46_v14  ;;  %vm66_vm1 = vcmp.gt.f32.partialorder %v24_v18, %v50_v15  ;;  %vm69_vm2 = vcmp.gt.f32.partialorder %v1874_v17, %v46_v14  ;;  %vm70_vm3 = vcmp.gt.f32.partialorder %v1874_v17, %v50_v15 }
  0x7f   :  { %v1498_v22 = vsel %vm65_vm0, 1.0, %v1807_v21  ;;  %v1499_v23 = vsel %vm66_vm1, 1.0, %v1807_v21  ;;  %v1502_v24 = vsel %vm69_vm2, 1.0, %v1807_v21  ;;  %v1503_v25 = vsel %vm70_vm3, 1.0, %v1807_v21 }
  0x80   :  { %v137_v26 = vadd.f32 %v1499_v23, %v1498_v22  ;;  %v143_v29 = vadd.f32 %v1503_v25, %v1502_v24  ;;  %vm89_vm4 = vcmp.gt.f32.partialorder %v24_v18, %v1877_v19  ;;  %vm90_vm7 = vcmp.gt.f32.partialorder %v24_v18, %v1880_v20 }
  0x81   :  { %v1888_v27 = vpop.permute.xlu1 %38  ;;  %v29_v28 = vpop.permute.xlu0 %28  ;;  %v1506_v33 = vsel %vm89_vm4, 1.0, %v1807_v21  ;;  %v1507_v34 = vsel %vm90_vm7, 1.0, %v1807_v21  ;;  %vm93_vm10 = vcmp.gt.f32.partialorder %v1874_v17, %v1877_v19  ;;  %vm94_vm11 = vcmp.gt.f32.partialorder %v1874_v17, %v1880_v20 }
  0x82   :  { %138 = vadd.xlane.f32.xlu0 %v137_v26  ;;  %vm67_vm5 = vcmp.gt.f32.partialorder %v29_v28, %v46_v14  ;;  %vm68_vm6 = vcmp.gt.f32.partialorder %v29_v28, %v50_v15  ;;  %vm71_vm8 = vcmp.gt.f32.partialorder %v1888_v27, %v46_v14  ;;  %vm72_vm9 = vcmp.gt.f32.partialorder %v1888_v27, %v50_v15 }
  0x83   :  { %v1500_v30 = vsel %vm67_vm5, 1.0, %v1807_v21  ;;  %v1501_v31 = vsel %vm68_vm6, 1.0, %v1807_v21  ;;  %v1504_v35 = vsel %vm71_vm8, 1.0, %v1807_v21  ;;  %v1505_v36 = vsel %vm72_vm9, 1.0, %v1807_v21 }
  0x84   :  { %v140_v32 = vadd.f32 %v1501_v31, %v1500_v30  ;;  %vm91_vm12 = vcmp.gt.f32.partialorder %v29_v28, %v1877_v19  ;;  %vm92_vm13 = vcmp.gt.f32.partialorder %v29_v28, %v1880_v20  ;;  %v153_v37 = vadd.f32 %v1507_v34, %v1506_v33 }
  0x85   :  { %v146_v38 = vadd.f32 %v1505_v36, %v1504_v35  ;;  %v1510_v39 = vsel %vm93_vm10, 1.0, %v1807_v21  ;;  %v1511_v41 = vsel %vm94_vm11, 1.0, %v1807_v21  ;;  %v1508_v42 = vsel %vm91_vm12, 1.0, %v1807_v21  ;;  %v1934_v53 = vpop.permute.xlu0 %210  ;;  %v206_v54 = vpop.permute.xlu1 %205 }
  0x86   :  { %141 = vadd.xlane.f32.xlu1 %v140_v32  ;;  %144 = vadd.xlane.f32.xlu0 %v143_v29  ;;  %v1509_v43 = vsel %vm92_vm13, 1.0, %v1807_v21  ;;  %vm113_vm14 = vcmp.eq.f32.partialorder %v24_v18, %v1877_v19  ;;  %vm114_vm15 = vcmp.eq.f32.partialorder %v24_v18, %v1880_v20  ;;  %vm95_vm0 = vcmp.gt.f32.partialorder %v1888_v27, %v1877_v19 }
  0x87   :  { %vm96_vm1 = vcmp.gt.f32.partialorder %v1888_v27, %v1880_v20  ;;  %v159_v45 = vadd.f32 %v1511_v41, %v1510_v39  ;;  %v156_v46 = vadd.f32 %v1509_v43, %v1508_v42  ;;  %v1514_v47 = vsel %vm113_vm14, 1.0, %v1807_v21 }
  0x88   :  { %v1515_v50 = vsel %vm114_vm15, 1.0, %v1807_v21  ;;  %v1512_v51 = vsel %vm95_vm0, 1.0, %v1807_v21  ;;  %v1513_v52 = vsel %vm96_vm1, 1.0, %v1807_v21  ;;  %vm117_vm2 = vcmp.eq.f32.partialorder %v1874_v17, %v1877_v19 }
  0x89   :  { %vm118_vm3 = vcmp.eq.f32.partialorder %v1874_v17, %v1880_v20  ;;  %vm115_vm4 = vcmp.eq.f32.partialorder %v29_v28, %v1877_v19  ;;  %vm116_vm5 = vcmp.eq.f32.partialorder %v29_v28, %v1880_v20  ;;  %v169_v56 = vadd.f32 %v1515_v50, %v1514_v47  ;;  %v216_v2 = vpop.permute.xlu1 %215  ;;  %v1565_v47 = vld [vmem:[%s2855_s2 + $0x58] sm:$0xff] }
  0x8a   :  { %154 = vadd.xlane.f32.xlu1 %v153_v37  ;;  %147 = vadd.xlane.f32.xlu0 %v146_v38  ;;  %v162_v57 = vadd.f32 %v1513_v52, %v1512_v51  ;;  %v1518_v58 = vsel %vm117_vm2, 1.0, %v1807_v21  ;;  %v1519_v60 = vsel %vm118_vm3, 1.0, %v1807_v21  ;;  %v1516_v61 = vsel %vm115_vm4, 1.0, %v1807_v21 }
  0x8b   :  { %v1517_v62 = vsel %vm116_vm5, 1.0, %v1807_v21  ;;  %vm249_vm6 = vcmp.gt.f32.partialorder %v1934_v53, %v1920_v44  ;;  %vm250_vm7 = vcmp.gt.f32.partialorder %v1934_v53, %v1924_v48  ;;  %vm119_vm8 = vcmp.eq.f32.partialorder %v1888_v27, %v1877_v19 }
  0x8c   :  { %vm120_vm9 = vcmp.eq.f32.partialorder %v1888_v27, %v1880_v20  ;;  %v175_v63 = vadd.f32 %v1519_v60, %v1518_v58  ;;  %v172_v0 = vadd.f32 %v1517_v62, %v1516_v61  ;;  %v1528_v1 = vsel %vm249_vm6, 1.0, %v1807_v21 }
  0x8d   :  { %v1529_v3 = vsel %vm250_vm7, 1.0, %v1807_v21  ;;  %v1520_v4 = vsel %vm119_vm8, 1.0, %v1807_v21  ;;  %v1521_v5 = vsel %vm120_vm9, 1.0, %v1807_v21  ;;  %vm271_vm10 = vcmp.gt.f32.partialorder %v206_v54, %v1941_v55  ;;  %v221_v14 = vpop.permute.xlu1 %220 }
  0x8e   :  { %160 = vadd.xlane.f32.xlu1 %v159_v45  ;;  %157 = vadd.xlane.f32.xlu0 %v156_v46  ;;  %vm272_vm11 = vcmp.gt.f32.partialorder %v206_v54, %v1945_v59  ;;  %vm247_vm12 = vcmp.gt.f32.partialorder %v206_v54, %v1920_v44  ;;  %vm248_vm13 = vcmp.gt.f32.partialorder %v206_v54, %v1924_v48  ;;  %v1534_v8 = vsel %vm271_vm10, 1.0, %v1807_v21  ;;  %v1562_v45 = vld [vmem:[%s2855_s2 + $0x40] sm:$0xff]  ;;  %v1564_v46 = vld [vmem:[%s2855_s2 + $0x50] sm:$0xff] }
  0x8f   :  { %v322_v6 = vadd.f32 %v1529_v3, %v1528_v1  ;;  %v178_v7 = vadd.f32 %v1521_v5, %v1520_v4  ;;  %v1535_v9 = vsel %vm272_vm11, 1.0, %v1807_v21  ;;  %v1526_v10 = vsel %vm247_vm12, 1.0, %v1807_v21  ;;  %v407_v4 = vld [vmem:[%s2856_s0] sm:$0x3] }
  0x90   :  { %v1527_v13 = vsel %vm248_vm13, 1.0, %v1807_v21  ;;  %vm275_vm14 = vcmp.gt.f32.partialorder %v216_v2, %v1941_v55  ;;  %vm276_vm15 = vcmp.gt.f32.partialorder %v216_v2, %v1945_v59  ;;  %vm251_vm0 = vcmp.gt.f32.partialorder %v216_v2, %v1920_v44 }
  0x91   :  { %vm252_vm1 = vcmp.gt.f32.partialorder %v216_v2, %v1924_v48  ;;  %v335_v15 = vadd.f32 %v1535_v9, %v1534_v8  ;;  %v319_v16 = vadd.f32 %v1527_v13, %v1526_v10  ;;  %v1538_v17 = vsel %vm275_vm14, 1.0, %v1807_v21 }
  0x92   :  { %170 = vadd.xlane.f32.xlu1 %v169_v56  ;;  %163 = vadd.xlane.f32.xlu0 %v162_v57  ;;  %v1539_v18 = vsel %vm276_vm15, 1.0, %v1807_v21  ;;  %v1530_v19 = vsel %vm251_vm0, 1.0, %v1807_v21  ;;  %v1531_v20 = vsel %vm252_vm1, 1.0, %v1807_v21  ;;  %vm295_vm2 = vcmp.eq.f32.partialorder %v206_v54, %v1941_v55 }
  0x93   :  { %vm296_vm3 = vcmp.eq.f32.partialorder %v206_v54, %v1945_v59  ;;  %vm253_vm4 = vcmp.gt.f32.partialorder %v221_v14, %v1920_v44  ;;  %vm254_vm5 = vcmp.gt.f32.partialorder %v221_v14, %v1924_v48  ;;  %v341_v22 = vadd.f32 %v1539_v18, %v1538_v17  ;;  %v1563_v48 = vld [vmem:[%s2855_s2 + $0x48] sm:$0xff] }
  0x94   :  { %v325_v23 = vadd.f32 %v1531_v20, %v1530_v19  ;;  %v1542_v24 = vsel %vm295_vm2, 1.0, %v1807_v21  ;;  %v1543_v25 = vsel %vm296_vm3, 1.0, %v1807_v21  ;;  %v1532_v26 = vsel %vm253_vm4, 1.0, %v1807_v21 }
  0x95   :  { %v1533_v27 = vsel %vm254_vm5, 1.0, %v1807_v21  ;;  %vm299_vm6 = vcmp.eq.f32.partialorder %v216_v2, %v1941_v55  ;;  %vm300_vm7 = vcmp.eq.f32.partialorder %v216_v2, %v1945_v59  ;;  %vm273_vm8 = vcmp.gt.f32.partialorder %v1934_v53, %v1941_v55 }
  0x96   :  { %176 = vadd.xlane.f32.xlu1 %v175_v63  ;;  %173 = vadd.xlane.f32.xlu0 %v172_v0  ;;  %vm274_vm9 = vcmp.gt.f32.partialorder %v1934_v53, %v1945_v59  ;;  %v351_v28 = vadd.f32 %v1543_v25, %v1542_v24  ;;  %v328_v29 = vadd.f32 %v1533_v27, %v1532_v26  ;;  %v1546_v30 = vsel %vm299_vm6, 1.0, %v1807_v21  ;;  %v419_v24 = vld [vmem:[%s2857_s1] sm:$0x3] }
  0x97   :  { %v1547_v31 = vsel %vm300_vm7, 1.0, %v1807_v21  ;;  %v1536_v32 = vsel %vm273_vm8, 1.0, %v1807_v21  ;;  %v1537_v33 = vsel %vm274_vm9, 1.0, %v1807_v21  ;;  %vm277_vm10 = vcmp.gt.f32.partialorder %v221_v14, %v1941_v55 }
  0x98   :  { %vm278_vm11 = vcmp.gt.f32.partialorder %v221_v14, %v1945_v59  ;;  %v357_v34 = vadd.f32 %v1547_v31, %v1546_v30  ;;  %v338_v35 = vadd.f32 %v1537_v33, %v1536_v32  ;;  %v1540_v36 = vsel %vm277_vm10, 1.0, %v1807_v21 }
  0x99   :  { %v1541_v37 = vsel %vm278_vm11, 1.0, %v1807_v21  ;;  %vm297_vm12 = vcmp.eq.f32.partialorder %v1934_v53, %v1941_v55  ;;  %vm298_vm13 = vcmp.eq.f32.partialorder %v1934_v53, %v1945_v59  ;;  %vm301_vm14 = vcmp.eq.f32.partialorder %v221_v14, %v1941_v55 }
  0x9a   :  { %323 = vadd.xlane.f32.xlu1 %v322_v6  ;;  %179 = vadd.xlane.f32.xlu0 %v178_v7  ;;  %v344_v38 = vadd.f32 %v1541_v37, %v1540_v36  ;;  %v1544_v39 = vsel %vm297_vm12, 1.0, %v1807_v21  ;;  %v1545_v40 = vsel %vm298_vm13, 1.0, %v1807_v21  ;;  %vm302_vm15 = vcmp.eq.f32.partialorder %v221_v14, %v1945_v59 }
  0x9b   :  { %v354_v41 = vadd.f32 %v1545_v40, %v1544_v39  ;;  %v1548_v42 = vsel %vm301_vm14, 1.0, %v1807_v21  ;;  %v1549_v43 = vsel %vm302_vm15, 1.0, %v1807_v21  ;;  %vm185_vm0 = vcmask 7168  }
  0x9c   :  { %v360_v44 = vadd.f32 %v1549_v43, %v1548_v42  ;;  %v412_v7 = vrot.slane %v407_v4, %v1862_v11  ;;  %v416_v8 = vrot.slane %v407_v4, %v1864_v12 }
  0x9e   :  { %336 = vadd.xlane.f32.xlu1 %v335_v15  ;;  %320 = vadd.xlane.f32.xlu0 %v319_v16 }
  0xa2   :  { %342 = vadd.xlane.f32.xlu1 %v341_v22  ;;  %326 = vadd.xlane.f32.xlu0 %v325_v23 }
  0xa6   :  { %352 = vadd.xlane.f32.xlu1 %v351_v28  ;;  %329 = vadd.xlane.f32.xlu0 %v328_v29  ;;  %v424_v28 = vrot.slane %v419_v24, %v1862_v11  ;;  %v428_v29 = vrot.slane %v419_v24, %v1864_v12 }
  0xaa   :  { %358 = vadd.xlane.f32.xlu1 %v357_v34  ;;  %339 = vadd.xlane.f32.xlu0 %v338_v35 }
  0xae   :  { %345 = vadd.xlane.f32.xlu0 %v344_v38 }
  0xb2   :  { %355 = vadd.xlane.f32.xlu0 %v354_v41 }
  0xb6   :  { %361 = vadd.xlane.f32.xlu0 %v360_v44 }
  0xbb   :  { %389 = vperm.xlu1 %1805, %v1562_v45  }
  0xbf   :  { %399 = vperm.xlu1 %1805, %v1564_v46  }
  0xc3   :  { %404 = vperm.xlu1 %1805, %v1565_v47  }
  0xcc   :  { %394 = vperm.xlu0 %1804, %v1563_v48  }
 0x10b   :  { %v139_v49 = vpop.xlane.xlu0 %138 }
 0x10c   :  { %186 = vst.msk [vmem:[%s2858_s3] sm:$0xff] %vm185_vm0, %v139_v49 }
 0x10f   :  { %v142_v50 = vpop.xlane.xlu1 %141  ;;  %v145_v51 = vpop.xlane.xlu0 %144 }
 0x110   :  { %187 = vst.msk [vmem:[%s2858_s3 + $0x8] sm:$0xff] %vm185_vm0, %v142_v50  ;;  %188 = vst.msk [vmem:[%s2858_s3 + $0x10] sm:$0xff] %vm185_vm0, %v145_v51 }
 0x113   :  { %v155_v52 = vpop.xlane.xlu1 %154  ;;  %v148_v53 = vpop.xlane.xlu0 %147 }
 0x114   :  { %190 = vst.msk [vmem:[%s2859_s4] sm:$0xff] %vm185_vm0, %v155_v52  ;;  %189 = vst.msk [vmem:[%s2858_s3 + $0x18] sm:$0xff] %vm185_vm0, %v148_v53 }
 0x117   :  { %v161_v54 = vpop.xlane.xlu1 %160  ;;  %v158_v55 = vpop.xlane.xlu0 %157 }
 0x118   :  { %192 = vst.msk [vmem:[%s2859_s4 + $0x10] sm:$0xff] %vm185_vm0, %v161_v54  ;;  %191 = vst.msk [vmem:[%s2859_s4 + $0x8] sm:$0xff] %vm185_vm0, %v158_v55 }
 0x11b   :  { %v171_v56 = vpop.xlane.xlu1 %170  ;;  %v164_v57 = vpop.xlane.xlu0 %163 }
 0x11c   :  { %194 = vst.msk [vmem:[%s2860_s5] sm:$0xff] %vm185_vm0, %v171_v56  ;;  %193 = vst.msk [vmem:[%s2859_s4 + $0x18] sm:$0xff] %vm185_vm0, %v164_v57 }
 0x11f   :  { %v177_v58 = vpop.xlane.xlu1 %176  ;;  %v174_v59 = vpop.xlane.xlu0 %173 }
 0x120   :  { %196 = vst.msk [vmem:[%s2860_s5 + $0x10] sm:$0xff] %vm185_vm0, %v177_v58  ;;  %195 = vst.msk [vmem:[%s2860_s5 + $0x8] sm:$0xff] %vm185_vm0, %v174_v59  ;;  %v1602_v58 = vld [vmem:[%s2855_s2 + $0x60] sm:$0xff]  ;;  %v1603_v59 = vld [vmem:[%s2855_s2 + $0x68] sm:$0xff] }
 0x123   :  { %v324_v60 = vpop.xlane.xlu1 %323  ;;  %v180_v61 = vpop.xlane.xlu0 %179 }
 0x124   :  { %1551 = vst.msk [vmem:[%s2858_s3 + $0x28] sm:$0xff] %vm185_vm0, %v324_v60  ;;  %197 = vst.msk [vmem:[%s2860_s5 + $0x18] sm:$0xff] %vm185_vm0, %v180_v61  ;;  %v1604_v60 = vld [vmem:[%s2855_s2 + $0x70] sm:$0xff]  ;;  %v1605_v61 = vld [vmem:[%s2855_s2 + $0x78] sm:$0xff] }
 0x127   :  { %v337_v62 = vpop.xlane.xlu1 %336  ;;  %v321_v63 = vpop.xlane.xlu0 %320 }
 0x128   :  { %1554 = vst.msk [vmem:[%s2859_s4 + $0x20] sm:$0xff] %vm185_vm0, %v337_v62  ;;  %1550 = vst.msk [vmem:[%s2858_s3 + $0x20] sm:$0xff] %vm185_vm0, %v321_v63 }
 0x12b   :  { %v343_v0 = vpop.xlane.xlu1 %342  ;;  %v327_v1 = vpop.xlane.xlu0 %326 }
 0x12c   :  { %1556 = vst.msk [vmem:[%s2859_s4 + $0x30] sm:$0xff] %vm185_vm0, %v343_v0  ;;  %1552 = vst.msk [vmem:[%s2858_s3 + $0x30] sm:$0xff] %vm185_vm0, %v327_v1 }
 0x12f   :  { %v353_v2 = vpop.xlane.xlu1 %352  ;;  %v330_v3 = vpop.xlane.xlu0 %329 }
 0x130   :  { %1558 = vst.msk [vmem:[%s2860_s5 + $0x20] sm:$0xff] %vm185_vm0, %v353_v2  ;;  %1553 = vst.msk [vmem:[%s2858_s3 + $0x38] sm:$0xff] %vm185_vm0, %v330_v3 }
 0x133   :  { %v359_v5 = vpop.xlane.xlu1 %358  ;;  %v340_v6 = vpop.xlane.xlu0 %339 }
 0x134   :  { %1560 = vst.msk [vmem:[%s2860_s5 + $0x30] sm:$0xff] %vm185_vm0, %v359_v5  ;;  %1555 = vst.msk [vmem:[%s2859_s4 + $0x28] sm:$0xff] %vm185_vm0, %v340_v6 }
 0x137   :  { %v2111_v9 = vpop.permute.xlu1 %389  ;;  %v346_v10 = vpop.xlane.xlu0 %345 }
 0x138   :  { %1557 = vst.msk [vmem:[%s2859_s4 + $0x38] sm:$0xff] %vm185_vm0, %v346_v10  ;;  %vm431_vm1 = vcmp.gt.f32.partialorder %v2111_v9, %v412_v7  ;;  %vm432_vm2 = vcmp.gt.f32.partialorder %v2111_v9, %v416_v8  ;;  %vm455_vm9 = vcmp.gt.f32.partialorder %v2111_v9, %v424_v28  ;;  %vm456_vm10 = vcmp.gt.f32.partialorder %v2111_v9, %v428_v29 }
 0x139   :  { %v1566_v13 = vsel %vm431_vm1, 1.0, %v1807_v21  ;;  %v1567_v14 = vsel %vm432_vm2, 1.0, %v1807_v21  ;;  %v1574_v37 = vsel %vm455_vm9, 1.0, %v1807_v21  ;;  %v1575_v40 = vsel %vm456_vm10, 1.0, %v1807_v21 }
 0x13a   :  { %v503_v15 = vadd.f32 %v1567_v14, %v1566_v13  ;;  %v519_v42 = vadd.f32 %v1575_v40, %v1574_v37  ;;  %v603_v13 = vld [vmem:[%s2857_s1] sm:$0x3] }
 0x13b   :  { %v2121_v16 = vpop.permute.xlu1 %399  ;;  %v356_v17 = vpop.xlane.xlu0 %355 }
 0x13c   :  { %1559 = vst.msk [vmem:[%s2860_s5 + $0x28] sm:$0xff] %vm185_vm0, %v356_v17  ;;  %504 = vadd.xlane.f32.xlu0 %v503_v15  ;;  %vm435_vm3 = vcmp.gt.f32.partialorder %v2121_v16, %v412_v7  ;;  %vm436_vm4 = vcmp.gt.f32.partialorder %v2121_v16, %v416_v8  ;;  %vm459_vm15 = vcmp.gt.f32.partialorder %v2121_v16, %v424_v28 }
 0x13d   :  { %v1570_v18 = vsel %vm435_vm3, 1.0, %v1807_v21  ;;  %v1571_v19 = vsel %vm436_vm4, 1.0, %v1807_v21  ;;  %vm460_vm3 = vcmp.gt.f32.partialorder %v2121_v16, %v428_v29  ;;  %vm479_vm4 = vcmp.eq.f32.partialorder %v2111_v9, %v424_v28 }
 0x13e   :  { %v509_v20 = vadd.f32 %v1571_v19, %v1570_v18  ;;  %v1578_v45 = vsel %vm459_vm15, 1.0, %v1807_v21  ;;  %v1579_v46 = vsel %vm460_vm3, 1.0, %v1807_v21  ;;  %v1582_v51 = vsel %vm479_vm4, 1.0, %v1807_v21 }
 0x13f   :  { %v405_v22 = vpop.permute.xlu1 %404  ;;  %v362_v23 = vpop.xlane.xlu0 %361  ;;  %v525_v48 = vadd.f32 %v1579_v46, %v1578_v45  ;;  %vm484_vm9 = vcmp.eq.f32.partialorder %v2121_v16, %v428_v29  ;;  %v2240_v17 = vrot.slane %v603_v13, %v1864_v12 }
 0x140   :  { %1561 = vst.msk [vmem:[%s2860_s5 + $0x38] sm:$0xff] %vm185_vm0, %v362_v23  ;;  %510 = vadd.xlane.f32.xlu0 %v509_v20  ;;  %vm437_vm5 = vcmp.gt.f32.partialorder %v405_v22, %v412_v7  ;;  %vm438_vm6 = vcmp.gt.f32.partialorder %v405_v22, %v416_v8  ;;  %vm461_vm7 = vcmp.gt.f32.partialorder %v405_v22, %v424_v28  ;;  %v1587_v56 = vsel %vm484_vm9, 1.0, %v1807_v21 }
 0x141   :  { %v1572_v25 = vsel %vm437_vm5, 1.0, %v1807_v21  ;;  %v1573_v26 = vsel %vm438_vm6, 1.0, %v1807_v21  ;;  %vm462_vm8 = vcmp.gt.f32.partialorder %v405_v22, %v428_v29  ;;  %v1580_v38 = vsel %vm461_vm7, 1.0, %v1807_v21 }
 0x142   :  { %v512_v27 = vadd.f32 %v1573_v26, %v1572_v25  ;;  %v1581_v39 = vsel %vm462_vm8, 1.0, %v1807_v21  ;;  %vm485_vm5 = vcmp.eq.f32.partialorder %v405_v22, %v424_v28  ;;  %vm486_vm6 = vcmp.eq.f32.partialorder %v405_v22, %v428_v29 }
 0x143   :  { %v528_v41 = vadd.f32 %v1581_v39, %v1580_v38  ;;  %vm480_vm7 = vcmp.eq.f32.partialorder %v2111_v9, %v428_v29  ;;  %v1588_v49 = vsel %vm485_vm5, 1.0, %v1807_v21  ;;  %v1589_v50 = vsel %vm486_vm6, 1.0, %v1807_v21  ;;  %v591_v9 = vld [vmem:[%s2856_s0] sm:$0x3] }
 0x144   :  { %513 = vadd.xlane.f32.xlu0 %v512_v27  ;;  %v1583_v52 = vsel %vm480_vm7, 1.0, %v1807_v21  ;;  %vm483_vm8 = vcmp.eq.f32.partialorder %v2121_v16, %v424_v28  ;;  %v544_v53 = vadd.f32 %v1589_v50, %v1588_v49  ;;  %v596_v14 = vrot.slane %v591_v9, %v1862_v11 }
 0x145   :  { %v535_v54 = vadd.f32 %v1583_v52, %v1582_v51  ;;  %v1586_v55 = vsel %vm483_vm8, 1.0, %v1807_v21  ;;  %v600_v15 = vrot.slane %v591_v9, %v1864_v12  ;;  %v2237_v16 = vrot.slane %v603_v13, %v1862_v11 }
 0x146   :  { %v541_v57 = vadd.f32 %v1587_v56, %v1586_v55 }
 0x147   :  { %v395_v30 = vpop.permute.xlu0 %394 }
 0x148   :  { %vm457_vm11 = vcmp.gt.f32.partialorder %v395_v30, %v424_v28  ;;  %vm458_vm12 = vcmp.gt.f32.partialorder %v395_v30, %v428_v29  ;;  %vm433_vm13 = vcmp.gt.f32.partialorder %v395_v30, %v412_v7  ;;  %vm434_vm14 = vcmp.gt.f32.partialorder %v395_v30, %v416_v8 }
 0x149   :  { %v1576_v31 = vsel %vm457_vm11, 1.0, %v1807_v21  ;;  %v1577_v32 = vsel %vm458_vm12, 1.0, %v1807_v21  ;;  %v1568_v33 = vsel %vm433_vm13, 1.0, %v1807_v21  ;;  %v1569_v34 = vsel %vm434_vm14, 1.0, %v1807_v21 }
 0x14a   :  { %v522_v35 = vadd.f32 %v1577_v32, %v1576_v31  ;;  %v506_v36 = vadd.f32 %v1569_v34, %v1568_v33  ;;  %vm481_vm1 = vcmp.eq.f32.partialorder %v395_v30, %v424_v28  ;;  %vm482_vm2 = vcmp.eq.f32.partialorder %v395_v30, %v428_v29 }
 0x14b   :  { %v1584_v43 = vsel %vm481_vm1, 1.0, %v1807_v21  ;;  %v1585_v44 = vsel %vm482_vm2, 1.0, %v1807_v21 }
 0x14c   :  { %523 = vadd.xlane.f32.xlu0 %v522_v35  ;;  %507 = vadd.xlane.f32.xlu1 %v506_v36  ;;  %v538_v47 = vadd.f32 %v1585_v44, %v1584_v43 }
 0x150   :  { %529 = vadd.xlane.f32.xlu0 %v528_v41  ;;  %520 = vadd.xlane.f32.xlu1 %v519_v42 }
 0x154   :  { %539 = vadd.xlane.f32.xlu0 %v538_v47  ;;  %526 = vadd.xlane.f32.xlu1 %v525_v48 }
 0x158   :  { %545 = vadd.xlane.f32.xlu0 %v544_v53  ;;  %536 = vadd.xlane.f32.xlu1 %v535_v54 }
 0x15c   :  { %542 = vadd.xlane.f32.xlu1 %v541_v57 }
 0x16d   :  { %573 = vperm.xlu1 %1805, %v1602_v58  }
 0x16e   :  { %578 = vperm.xlu0 %1804, %v1603_v59   ;;  %v1642_v59 = vld [vmem:[%s2855_s2 + $0x80] sm:$0xff] }
 0x171   :  { %583 = vperm.xlu1 %1805, %v1604_v60   ;;  %v1644_v60 = vld [vmem:[%s2855_s2 + $0x90] sm:$0xff] }
 0x175   :  { %588 = vperm.xlu1 %1805, %v1605_v61   ;;  %v1645_v61 = vld [vmem:[%s2855_s2 + $0x98] sm:$0xff] }
 0x1c5   :  { %v505_v62 = vpop.xlane.xlu0 %504 }
 0x1c6   :  { %1590 = vst.msk [vmem:[%s2858_s3 + $0x40] sm:$0xff] %vm185_vm0, %v505_v62  ;;  %v1643_v62 = vld [vmem:[%s2855_s2 + $0x88] sm:$0xff] }
 0x1c9   :  { %v511_v63 = vpop.xlane.xlu0 %510 }
 0x1ca   :  { %1592 = vst.msk [vmem:[%s2858_s3 + $0x50] sm:$0xff] %vm185_vm0, %v511_v63 }
 0x1cd   :  { %v514_v0 = vpop.xlane.xlu0 %513 }
 0x1ce   :  { %1593 = vst.msk [vmem:[%s2858_s3 + $0x58] sm:$0xff] %vm185_vm0, %v514_v0 }
 0x1d5   :  { %v508_v1 = vpop.xlane.xlu1 %507  ;;  %v524_v2 = vpop.xlane.xlu0 %523 }
 0x1d6   :  { %1591 = vst.msk [vmem:[%s2858_s3 + $0x48] sm:$0xff] %vm185_vm0, %v508_v1  ;;  %1595 = vst.msk [vmem:[%s2859_s4 + $0x48] sm:$0xff] %vm185_vm0, %v524_v2 }
 0x1d9   :  { %v521_v3 = vpop.xlane.xlu1 %520  ;;  %v530_v4 = vpop.xlane.xlu0 %529 }
 0x1da   :  { %1594 = vst.msk [vmem:[%s2859_s4 + $0x40] sm:$0xff] %vm185_vm0, %v521_v3  ;;  %1597 = vst.msk [vmem:[%s2859_s4 + $0x58] sm:$0xff] %vm185_vm0, %v530_v4 }
 0x1dd   :  { %v527_v5 = vpop.xlane.xlu1 %526  ;;  %v540_v6 = vpop.xlane.xlu0 %539 }
 0x1de   :  { %1596 = vst.msk [vmem:[%s2859_s4 + $0x50] sm:$0xff] %vm185_vm0, %v527_v5  ;;  %1599 = vst.msk [vmem:[%s2860_s5 + $0x48] sm:$0xff] %vm185_vm0, %v540_v6 }
 0x1e1   :  { %v537_v7 = vpop.xlane.xlu1 %536  ;;  %v546_v8 = vpop.xlane.xlu0 %545 }
 0x1e2   :  { %1598 = vst.msk [vmem:[%s2860_s5 + $0x40] sm:$0xff] %vm185_vm0, %v537_v7  ;;  %1601 = vst.msk [vmem:[%s2860_s5 + $0x58] sm:$0xff] %vm185_vm0, %v546_v8  ;;  %v775_v7 = vld [vmem:[%s2856_s0] sm:$0x3] }
 0x1e3   :  { %v784_v13 = vrot.slane %v775_v7, %v1864_v12 }
 0x1e5   :  { %v543_v10 = vpop.xlane.xlu1 %542 }
 0x1e6   :  { %1600 = vst.msk [vmem:[%s2860_s5 + $0x50] sm:$0xff] %vm185_vm0, %v543_v10  ;;  %v780_v10 = vrot.slane %v775_v7, %v1862_v11 }
 0x1e9   :  { %v574_v18 = vpop.permute.xlu1 %573  ;;  %v2242_v19 = vpop.permute.xlu0 %578 }
 0x1ea   :  { %vm615_vm10 = vcmp.gt.f32.partialorder %v574_v18, %v596_v14  ;;  %vm616_vm11 = vcmp.gt.f32.partialorder %v574_v18, %v600_v15  ;;  %vm617_vm12 = vcmp.gt.f32.partialorder %v2242_v19, %v596_v14  ;;  %vm618_vm13 = vcmp.gt.f32.partialorder %v2242_v19, %v600_v15 }
 0x1eb   :  { %v1606_v20 = vsel %vm615_vm10, 1.0, %v1807_v21  ;;  %v1607_v22 = vsel %vm616_vm11, 1.0, %v1807_v21  ;;  %v1608_v23 = vsel %vm617_vm12, 1.0, %v1807_v21  ;;  %v1609_v24 = vsel %vm618_vm13, 1.0, %v1807_v21 }
 0x1ec   :  { %v687_v25 = vadd.f32 %v1607_v22, %v1606_v20  ;;  %v690_v26 = vadd.f32 %v1609_v24, %v1608_v23  ;;  %vm639_vm14 = vcmp.gt.f32.partialorder %v574_v18, %v2237_v16  ;;  %vm640_vm15 = vcmp.gt.f32.partialorder %v574_v18, %v2240_v17  ;;  %v787_v22 = vld [vmem:[%s2857_s1] sm:$0x3] }
 0x1ed   :  { %v584_v27 = vpop.permute.xlu1 %583  ;;  %v1614_v28 = vsel %vm639_vm14, 1.0, %v1807_v21  ;;  %v1615_v29 = vsel %vm640_vm15, 1.0, %v1807_v21  ;;  %vm641_vm5 = vcmp.gt.f32.partialorder %v2242_v19, %v2237_v16  ;;  %vm642_vm6 = vcmp.gt.f32.partialorder %v2242_v19, %v2240_v17 }
 0x1ee   :  { %688 = vadd.xlane.f32.xlu0 %v687_v25  ;;  %691 = vadd.xlane.f32.xlu1 %v690_v26  ;;  %vm619_vm1 = vcmp.gt.f32.partialorder %v584_v27, %v596_v14  ;;  %vm620_vm2 = vcmp.gt.f32.partialorder %v584_v27, %v600_v15  ;;  %vm643_vm3 = vcmp.gt.f32.partialorder %v584_v27, %v2237_v16  ;;  %v1616_v41 = vsel %vm641_vm5, 1.0, %v1807_v21 }
 0x1ef   :  { %v1610_v30 = vsel %vm619_vm1, 1.0, %v1807_v21  ;;  %v1611_v31 = vsel %vm620_vm2, 1.0, %v1807_v21  ;;  %vm644_vm4 = vcmp.gt.f32.partialorder %v584_v27, %v2240_v17  ;;  %v703_v33 = vadd.f32 %v1615_v29, %v1614_v28 }
 0x1f0   :  { %v693_v32 = vadd.f32 %v1611_v31, %v1610_v30  ;;  %v1618_v35 = vsel %vm643_vm3, 1.0, %v1807_v21  ;;  %v1619_v36 = vsel %vm644_vm4, 1.0, %v1807_v21  ;;  %vm663_vm7 = vcmp.eq.f32.partialorder %v574_v18, %v2237_v16 }
 0x1f1   :  { %v589_v34 = vpop.permute.xlu1 %588  ;;  %vm664_vm10 = vcmp.eq.f32.partialorder %v574_v18, %v2240_v17  ;;  %v709_v40 = vadd.f32 %v1619_v36, %v1618_v35  ;;  %v1617_v42 = vsel %vm642_vm6, 1.0, %v1807_v21  ;;  %v1622_v43 = vsel %vm663_vm7, 1.0, %v1807_v21 }
 0x1f2   :  { %694 = vadd.xlane.f32.xlu0 %v693_v32  ;;  %704 = vadd.xlane.f32.xlu1 %v703_v33  ;;  %vm621_vm8 = vcmp.gt.f32.partialorder %v589_v34, %v596_v14  ;;  %vm622_vm9 = vcmp.gt.f32.partialorder %v589_v34, %v600_v15  ;;  %v1623_v44 = vsel %vm664_vm10, 1.0, %v1807_v21  ;;  %vm645_vm11 = vcmp.gt.f32.partialorder %v589_v34, %v2237_v16 }
 0x1f3   :  { %v1612_v37 = vsel %vm621_vm8, 1.0, %v1807_v21  ;;  %v1613_v38 = vsel %vm622_vm9, 1.0, %v1807_v21  ;;  %vm646_vm12 = vcmp.gt.f32.partialorder %v589_v34, %v2240_v17  ;;  %vm667_vm13 = vcmp.eq.f32.partialorder %v584_v27, %v2237_v16 }
 0x1f4   :  { %v696_v39 = vadd.f32 %v1613_v38, %v1612_v37  ;;  %vm668_vm14 = vcmp.eq.f32.partialorder %v584_v27, %v2240_v17  ;;  %v706_v45 = vadd.f32 %v1617_v42, %v1616_v41  ;;  %v719_v46 = vadd.f32 %v1623_v44, %v1622_v43 }
 0x1f5   :  { %v1620_v47 = vsel %vm645_vm11, 1.0, %v1807_v21  ;;  %v1621_v48 = vsel %vm646_vm12, 1.0, %v1807_v21  ;;  %v1626_v49 = vsel %vm667_vm13, 1.0, %v1807_v21  ;;  %v1627_v50 = vsel %vm668_vm14, 1.0, %v1807_v21 }
 0x1f6   :  { %697 = vadd.xlane.f32.xlu0 %v696_v39  ;;  %710 = vadd.xlane.f32.xlu1 %v709_v40  ;;  %vm665_vm15 = vcmp.eq.f32.partialorder %v2242_v19, %v2237_v16  ;;  %vm666_vm1 = vcmp.eq.f32.partialorder %v2242_v19, %v2240_v17  ;;  %v712_v51 = vadd.f32 %v1621_v48, %v1620_v47 }
 0x1f7   :  { %v725_v52 = vadd.f32 %v1627_v50, %v1626_v49  ;;  %v1624_v53 = vsel %vm665_vm15, 1.0, %v1807_v21  ;;  %v1625_v54 = vsel %vm666_vm1, 1.0, %v1807_v21  ;;  %vm669_vm2 = vcmp.eq.f32.partialorder %v589_v34, %v2237_v16 }
 0x1f8   :  { %vm670_vm3 = vcmp.eq.f32.partialorder %v589_v34, %v2240_v17  ;;  %v722_v55 = vadd.f32 %v1625_v54, %v1624_v53  ;;  %v1628_v56 = vsel %vm669_vm2, 1.0, %v1807_v21  ;;  %v792_v27 = vrot.slane %v787_v22, %v1862_v11 }
 0x1f9   :  { %v1629_v57 = vsel %vm670_vm3, 1.0, %v1807_v21  ;;  %v796_v28 = vrot.slane %v787_v22, %v1864_v12 }
 0x1fa   :  { %707 = vadd.xlane.f32.xlu0 %v706_v45  ;;  %720 = vadd.xlane.f32.xlu1 %v719_v46  ;;  %v728_v58 = vadd.f32 %v1629_v57, %v1628_v56 }
 0x1fe   :  { %713 = vadd.xlane.f32.xlu0 %v712_v51  ;;  %726 = vadd.xlane.f32.xlu1 %v725_v52 }
 0x202   :  { %723 = vadd.xlane.f32.xlu0 %v722_v55 }
 0x206   :  { %729 = vadd.xlane.f32.xlu0 %v728_v58 }
 0x20f   :  { %757 = vperm.xlu1 %1805, %v1642_v59  }
 0x213   :  { %767 = vperm.xlu1 %1805, %v1644_v60   ;;  %v1682_v60 = vld [vmem:[%s2855_s2 + $0xa0] sm:$0xff] }
 0x217   :  { %772 = vperm.xlu1 %1805, %v1645_v61   ;;  %v1683_v61 = vld [vmem:[%s2855_s2 + $0xa8] sm:$0xff] }
 0x21c   :  { %762 = vperm.xlu0 %1804, %v1643_v62   ;;  %v1684_v62 = vld [vmem:[%s2855_s2 + $0xb0] sm:$0xff] }
 0x277   :  { %v692_v63 = vpop.xlane.xlu1 %691  ;;  %v689_v0 = vpop.xlane.xlu0 %688 }
 0x278   :  { %1631 = vst.msk [vmem:[%s2858_s3 + $0x68] sm:$0xff] %vm185_vm0, %v692_v63  ;;  %1630 = vst.msk [vmem:[%s2858_s3 + $0x60] sm:$0xff] %vm185_vm0, %v689_v0  ;;  %v1685_v63 = vld [vmem:[%s2855_s2 + $0xb8] sm:$0xff] }
 0x27b   :  { %v705_v1 = vpop.xlane.xlu1 %704  ;;  %v695_v2 = vpop.xlane.xlu0 %694 }
 0x27c   :  { %1634 = vst.msk [vmem:[%s2859_s4 + $0x60] sm:$0xff] %vm185_vm0, %v705_v1  ;;  %1632 = vst.msk [vmem:[%s2858_s3 + $0x70] sm:$0xff] %vm185_vm0, %v695_v2 }
 0x27f   :  { %v711_v3 = vpop.xlane.xlu1 %710  ;;  %v698_v4 = vpop.xlane.xlu0 %697 }
 0x280   :  { %1636 = vst.msk [vmem:[%s2859_s4 + $0x70] sm:$0xff] %vm185_vm0, %v711_v3  ;;  %1633 = vst.msk [vmem:[%s2858_s3 + $0x78] sm:$0xff] %vm185_vm0, %v698_v4 }
 0x283   :  { %v721_v5 = vpop.xlane.xlu1 %720  ;;  %v708_v6 = vpop.xlane.xlu0 %707 }
 0x284   :  { %1638 = vst.msk [vmem:[%s2860_s5 + $0x60] sm:$0xff] %vm185_vm0, %v721_v5  ;;  %1635 = vst.msk [vmem:[%s2859_s4 + $0x68] sm:$0xff] %vm185_vm0, %v708_v6 }
 0x287   :  { %v727_v8 = vpop.xlane.xlu1 %726  ;;  %v714_v9 = vpop.xlane.xlu0 %713 }
 0x288   :  { %1640 = vst.msk [vmem:[%s2860_s5 + $0x70] sm:$0xff] %vm185_vm0, %v727_v8  ;;  %1637 = vst.msk [vmem:[%s2859_s4 + $0x78] sm:$0xff] %vm185_vm0, %v714_v9 }
 0x28b   :  { %v2347_v14 = vpop.permute.xlu1 %757  ;;  %v724_v15 = vpop.xlane.xlu0 %723 }
 0x28c   :  { %1639 = vst.msk [vmem:[%s2860_s5 + $0x68] sm:$0xff] %vm185_vm0, %v724_v15  ;;  %vm799_vm4 = vcmp.gt.f32.partialorder %v2347_v14, %v780_v10  ;;  %vm800_vm5 = vcmp.gt.f32.partialorder %v2347_v14, %v784_v13  ;;  %vm823_vm12 = vcmp.gt.f32.partialorder %v2347_v14, %v792_v27  ;;  %vm824_vm13 = vcmp.gt.f32.partialorder %v2347_v14, %v796_v28  ;;  %v971_v15 = vld [vmem:[%s2857_s1] sm:$0x3] }
 0x28d   :  { %v1646_v16 = vsel %vm799_vm4, 1.0, %v1807_v21  ;;  %v1647_v17 = vsel %vm800_vm5, 1.0, %v1807_v21  ;;  %v1654_v39 = vsel %vm823_vm12, 1.0, %v1807_v21  ;;  %v1655_v42 = vsel %vm824_vm13, 1.0, %v1807_v21 }
 0x28e   :  { %v871_v18 = vadd.f32 %v1647_v17, %v1646_v16  ;;  %v887_v44 = vadd.f32 %v1655_v42, %v1654_v39 }
 0x28f   :  { %v2357_v19 = vpop.permute.xlu1 %767  ;;  %v730_v20 = vpop.xlane.xlu0 %729 }
 0x290   :  { %1641 = vst.msk [vmem:[%s2860_s5 + $0x78] sm:$0xff] %vm185_vm0, %v730_v20  ;;  %872 = vadd.xlane.f32.xlu0 %v871_v18  ;;  %vm803_vm6 = vcmp.gt.f32.partialorder %v2357_v19, %v780_v10  ;;  %vm804_vm7 = vcmp.gt.f32.partialorder %v2357_v19, %v784_v13  ;;  %vm827_vm3 = vcmp.gt.f32.partialorder %v2357_v19, %v792_v27 }
 0x291   :  { %v1650_v23 = vsel %vm803_vm6, 1.0, %v1807_v21  ;;  %v1651_v24 = vsel %vm804_vm7, 1.0, %v1807_v21  ;;  %vm828_vm6 = vcmp.gt.f32.partialorder %v2357_v19, %v796_v28  ;;  %vm847_vm7 = vcmp.eq.f32.partialorder %v2347_v14, %v792_v27 }
 0x292   :  { %v877_v25 = vadd.f32 %v1651_v24, %v1650_v23  ;;  %v1658_v47 = vsel %vm827_vm3, 1.0, %v1807_v21  ;;  %v1659_v48 = vsel %vm828_vm6, 1.0, %v1807_v21  ;;  %v1662_v53 = vsel %vm847_vm7, 1.0, %v1807_v21 }
 0x293   :  { %v773_v26 = vpop.permute.xlu1 %772  ;;  %v893_v50 = vadd.f32 %v1659_v48, %v1658_v47  ;;  %vm852_vm12 = vcmp.eq.f32.partialorder %v2357_v19, %v796_v28  ;;  %v2471_v18 = vrot.slane %v971_v15, %v1862_v11 }
 0x294   :  { %878 = vadd.xlane.f32.xlu0 %v877_v25  ;;  %vm805_vm8 = vcmp.gt.f32.partialorder %v773_v26, %v780_v10  ;;  %vm806_vm9 = vcmp.gt.f32.partialorder %v773_v26, %v784_v13  ;;  %vm829_vm10 = vcmp.gt.f32.partialorder %v773_v26, %v792_v27  ;;  %vm830_vm11 = vcmp.gt.f32.partialorder %v773_v26, %v796_v28 }
 0x295   :  { %v1652_v29 = vsel %vm805_vm8, 1.0, %v1807_v21  ;;  %v1653_v30 = vsel %vm806_vm9, 1.0, %v1807_v21  ;;  %v1660_v40 = vsel %vm829_vm10, 1.0, %v1807_v21  ;;  %v1661_v41 = vsel %vm830_vm11, 1.0, %v1807_v21 }
 0x296   :  { %v880_v31 = vadd.f32 %v1653_v30, %v1652_v29  ;;  %v896_v43 = vadd.f32 %v1661_v41, %v1660_v40  ;;  %vm853_vm8 = vcmp.eq.f32.partialorder %v773_v26, %v792_v27  ;;  %vm854_vm9 = vcmp.eq.f32.partialorder %v773_v26, %v796_v28 }
 0x297   :  { %v763_v32 = vpop.permute.xlu0 %762  ;;  %vm848_vm10 = vcmp.eq.f32.partialorder %v2347_v14, %v796_v28  ;;  %v1668_v51 = vsel %vm853_vm8, 1.0, %v1807_v21  ;;  %v1669_v52 = vsel %vm854_vm9, 1.0, %v1807_v21  ;;  %vm851_vm11 = vcmp.eq.f32.partialorder %v2357_v19, %v792_v27 }
 0x298   :  { %881 = vadd.xlane.f32.xlu0 %v880_v31  ;;  %vm825_vm14 = vcmp.gt.f32.partialorder %v763_v32, %v792_v27  ;;  %vm826_vm15 = vcmp.gt.f32.partialorder %v763_v32, %v796_v28  ;;  %vm801_vm1 = vcmp.gt.f32.partialorder %v763_v32, %v780_v10  ;;  %vm802_vm2 = vcmp.gt.f32.partialorder %v763_v32, %v784_v13  ;;  %v959_v13 = vld [vmem:[%s2856_s0] sm:$0x3] }
 0x299   :  { %v1656_v33 = vsel %vm825_vm14, 1.0, %v1807_v21  ;;  %v1657_v34 = vsel %vm826_vm15, 1.0, %v1807_v21  ;;  %v1648_v35 = vsel %vm801_vm1, 1.0, %v1807_v21  ;;  %v1649_v36 = vsel %vm802_vm2, 1.0, %v1807_v21 }
 0x29a   :  { %v890_v37 = vadd.f32 %v1657_v34, %v1656_v33  ;;  %v874_v38 = vadd.f32 %v1649_v36, %v1648_v35  ;;  %vm849_vm4 = vcmp.eq.f32.partialorder %v763_v32, %v792_v27  ;;  %vm850_vm5 = vcmp.eq.f32.partialorder %v763_v32, %v796_v28 }
 0x29b   :  { %v1664_v45 = vsel %vm849_vm4, 1.0, %v1807_v21  ;;  %v1665_v46 = vsel %vm850_vm5, 1.0, %v1807_v21  ;;  %v1663_v54 = vsel %vm848_vm10, 1.0, %v1807_v21  ;;  %v912_v55 = vadd.f32 %v1669_v52, %v1668_v51 }
 0x29c   :  { %891 = vadd.xlane.f32.xlu0 %v890_v37  ;;  %875 = vadd.xlane.f32.xlu1 %v874_v38  ;;  %v906_v49 = vadd.f32 %v1665_v46, %v1664_v45  ;;  %v903_v56 = vadd.f32 %v1663_v54, %v1662_v53  ;;  %v1666_v57 = vsel %vm851_vm11, 1.0, %v1807_v21  ;;  %v1667_v58 = vsel %vm852_vm12, 1.0, %v1807_v21 }
 0x29d   :  { %v909_v59 = vadd.f32 %v1667_v58, %v1666_v57  ;;  %v964_v16 = vrot.slane %v959_v13, %v1862_v11  ;;  %v968_v17 = vrot.slane %v959_v13, %v1864_v12  ;;  %v2474_v19 = vrot.slane %v971_v15, %v1864_v12  ;;  %v1143_v15 = vld [vmem:[%s2856_s0] sm:$0x3] }
 0x2a0   :  { %897 = vadd.xlane.f32.xlu0 %v896_v43  ;;  %888 = vadd.xlane.f32.xlu1 %v887_v44 }
 0x2a4   :  { %907 = vadd.xlane.f32.xlu0 %v906_v49  ;;  %894 = vadd.xlane.f32.xlu1 %v893_v50 }
 0x2a8   :  { %913 = vadd.xlane.f32.xlu0 %v912_v55  ;;  %904 = vadd.xlane.f32.xlu1 %v903_v56 }
 0x2ac   :  { %910 = vadd.xlane.f32.xlu1 %v909_v59 }
 0x2bd   :  { %941 = vperm.xlu1 %1805, %v1682_v60  }
 0x2be   :  { %946 = vperm.xlu0 %1804, %v1683_v61   ;;  %v1722_v61 = vld [vmem:[%s2855_s2 + $0xc0] sm:$0xff] }
 0x2c1   :  { %951 = vperm.xlu1 %1805, %v1684_v62   ;;  %v1724_v62 = vld [vmem:[%s2855_s2 + $0xd0] sm:$0xff] }
 0x2c5   :  { %956 = vperm.xlu1 %1805, %v1685_v63   ;;  %v1725_v63 = vld [vmem:[%s2855_s2 + $0xd8] sm:$0xff] }
 0x319   :  { %v873_v0 = vpop.xlane.xlu0 %872 }
 0x31a   :  { %1670 = vst.msk [vmem:[%s2858_s3 + $0x80] sm:$0xff] %vm185_vm0, %v873_v0  ;;  %v1763_v0 = vld [vmem:[%s2855_s2 + $0xe8] sm:$0xff] }
 0x31d   :  { %v879_v1 = vpop.xlane.xlu0 %878 }
 0x31e   :  { %1672 = vst.msk [vmem:[%s2858_s3 + $0x90] sm:$0xff] %vm185_vm0, %v879_v1  ;;  %v1723_v1 = vld [vmem:[%s2855_s2 + $0xc8] sm:$0xff] }
 0x321   :  { %v882_v2 = vpop.xlane.xlu0 %881 }
 0x322   :  { %1673 = vst.msk [vmem:[%s2858_s3 + $0x98] sm:$0xff] %vm185_vm0, %v882_v2  ;;  %v1765_v2 = vld [vmem:[%s2855_s2 + $0xf8] sm:$0xff] }
 0x325   :  { %v876_v3 = vpop.xlane.xlu1 %875  ;;  %v892_v4 = vpop.xlane.xlu0 %891 }
 0x326   :  { %1671 = vst.msk [vmem:[%s2858_s3 + $0x88] sm:$0xff] %vm185_vm0, %v876_v3  ;;  %1675 = vst.msk [vmem:[%s2859_s4 + $0x88] sm:$0xff] %vm185_vm0, %v892_v4  ;;  %v1762_v3 = vld [vmem:[%s2855_s2 + $0xe0] sm:$0xff]  ;;  %v1764_v4 = vld [vmem:[%s2855_s2 + $0xf0] sm:$0xff] }
 0x329   :  { %v889_v5 = vpop.xlane.xlu1 %888  ;;  %v898_v6 = vpop.xlane.xlu0 %897 }
 0x32a   :  { %1674 = vst.msk [vmem:[%s2859_s4 + $0x80] sm:$0xff] %vm185_vm0, %v889_v5  ;;  %1677 = vst.msk [vmem:[%s2859_s4 + $0x98] sm:$0xff] %vm185_vm0, %v898_v6 }
 0x32d   :  { %v895_v7 = vpop.xlane.xlu1 %894  ;;  %v908_v8 = vpop.xlane.xlu0 %907 }
 0x32e   :  { %1676 = vst.msk [vmem:[%s2859_s4 + $0x90] sm:$0xff] %vm185_vm0, %v895_v7  ;;  %1679 = vst.msk [vmem:[%s2860_s5 + $0x88] sm:$0xff] %vm185_vm0, %v908_v8 }
 0x331   :  { %v905_v9 = vpop.xlane.xlu1 %904  ;;  %v914_v10 = vpop.xlane.xlu0 %913 }
 0x332   :  { %1678 = vst.msk [vmem:[%s2860_s5 + $0x80] sm:$0xff] %vm185_vm0, %v905_v9  ;;  %1681 = vst.msk [vmem:[%s2860_s5 + $0x98] sm:$0xff] %vm185_vm0, %v914_v10 }
 0x335   :  { %v911_v14 = vpop.xlane.xlu1 %910 }
 0x336   :  { %1680 = vst.msk [vmem:[%s2860_s5 + $0x90] sm:$0xff] %vm185_vm0, %v911_v14 }
 0x339   :  { %v942_v20 = vpop.permute.xlu1 %941  ;;  %v2476_v22 = vpop.permute.xlu0 %946 }
 0x33a   :  { %vm983_vm13 = vcmp.gt.f32.partialorder %v942_v20, %v964_v16  ;;  %vm984_vm14 = vcmp.gt.f32.partialorder %v942_v20, %v968_v17  ;;  %vm985_vm15 = vcmp.gt.f32.partialorder %v2476_v22, %v964_v16  ;;  %vm986_vm1 = vcmp.gt.f32.partialorder %v2476_v22, %v968_v17 }
 0x33b   :  { %v1686_v23 = vsel %vm983_vm13, 1.0, %v1807_v21  ;;  %v1687_v24 = vsel %vm984_vm14, 1.0, %v1807_v21  ;;  %v1688_v25 = vsel %vm985_vm15, 1.0, %v1807_v21  ;;  %v1689_v26 = vsel %vm986_vm1, 1.0, %v1807_v21 }
 0x33c   :  { %v1055_v27 = vadd.f32 %v1687_v24, %v1686_v23  ;;  %v1058_v28 = vadd.f32 %v1689_v26, %v1688_v25  ;;  %vm1007_vm2 = vcmp.gt.f32.partialorder %v942_v20, %v2471_v18  ;;  %vm1008_vm3 = vcmp.gt.f32.partialorder %v942_v20, %v2474_v19 }
 0x33d   :  { %v952_v29 = vpop.permute.xlu1 %951  ;;  %v1694_v30 = vsel %vm1007_vm2, 1.0, %v1807_v21  ;;  %v1695_v31 = vsel %vm1008_vm3, 1.0, %v1807_v21  ;;  %vm1009_vm8 = vcmp.gt.f32.partialorder %v2476_v22, %v2471_v18  ;;  %vm1010_vm9 = vcmp.gt.f32.partialorder %v2476_v22, %v2474_v19 }
 0x33e   :  { %1056 = vadd.xlane.f32.xlu0 %v1055_v27  ;;  %1059 = vadd.xlane.f32.xlu1 %v1058_v28  ;;  %vm987_vm4 = vcmp.gt.f32.partialorder %v952_v29, %v964_v16  ;;  %vm988_vm5 = vcmp.gt.f32.partialorder %v952_v29, %v968_v17  ;;  %vm1011_vm6 = vcmp.gt.f32.partialorder %v952_v29, %v2471_v18  ;;  %v1696_v43 = vsel %vm1009_vm8, 1.0, %v1807_v21  ;;  %v1155_v28 = vld [vmem:[%s2857_s1] sm:$0x3] }
 0x33f   :  { %v1690_v32 = vsel %vm987_vm4, 1.0, %v1807_v21  ;;  %v1691_v33 = vsel %vm988_vm5, 1.0, %v1807_v21  ;;  %vm1012_vm7 = vcmp.gt.f32.partialorder %v952_v29, %v2474_v19  ;;  %v1071_v35 = vadd.f32 %v1695_v31, %v1694_v30 }
 0x340   :  { %v1061_v34 = vadd.f32 %v1691_v33, %v1690_v32  ;;  %v1698_v37 = vsel %vm1011_vm6, 1.0, %v1807_v21  ;;  %v1699_v38 = vsel %vm1012_vm7, 1.0, %v1807_v21  ;;  %vm1031_vm10 = vcmp.eq.f32.partialorder %v942_v20, %v2471_v18 }
 0x341   :  { %v957_v36 = vpop.permute.xlu1 %956  ;;  %vm1032_vm13 = vcmp.eq.f32.partialorder %v942_v20, %v2474_v19  ;;  %v1077_v42 = vadd.f32 %v1699_v38, %v1698_v37  ;;  %v1697_v44 = vsel %vm1010_vm9, 1.0, %v1807_v21  ;;  %v1702_v45 = vsel %vm1031_vm10, 1.0, %v1807_v21 }
 0x342   :  { %1062 = vadd.xlane.f32.xlu0 %v1061_v34  ;;  %1072 = vadd.xlane.f32.xlu1 %v1071_v35  ;;  %vm989_vm11 = vcmp.gt.f32.partialorder %v957_v36, %v964_v16  ;;  %vm990_vm12 = vcmp.gt.f32.partialorder %v957_v36, %v968_v17  ;;  %v1703_v46 = vsel %vm1032_vm13, 1.0, %v1807_v21  ;;  %vm1013_vm14 = vcmp.gt.f32.partialorder %v957_v36, %v2471_v18 }
 0x343   :  { %v1692_v39 = vsel %vm989_vm11, 1.0, %v1807_v21  ;;  %v1693_v40 = vsel %vm990_vm12, 1.0, %v1807_v21  ;;  %vm1014_vm15 = vcmp.gt.f32.partialorder %v957_v36, %v2474_v19  ;;  %vm1035_vm1 = vcmp.eq.f32.partialorder %v952_v29, %v2471_v18 }
 0x344   :  { %v1064_v41 = vadd.f32 %v1693_v40, %v1692_v39  ;;  %vm1036_vm2 = vcmp.eq.f32.partialorder %v952_v29, %v2474_v19  ;;  %v1074_v47 = vadd.f32 %v1697_v44, %v1696_v43  ;;  %v1087_v48 = vadd.f32 %v1703_v46, %v1702_v45  ;;  %v1327_v46 = vld [vmem:[%s2856_s0] sm:$0x3] }
 0x345   :  { %v1700_v49 = vsel %vm1013_vm14, 1.0, %v1807_v21  ;;  %v1701_v50 = vsel %vm1014_vm15, 1.0, %v1807_v21  ;;  %v1706_v51 = vsel %vm1035_vm1, 1.0, %v1807_v21  ;;  %v1707_v52 = vsel %vm1036_vm2, 1.0, %v1807_v21 }
 0x346   :  { %1065 = vadd.xlane.f32.xlu0 %v1064_v41  ;;  %1078 = vadd.xlane.f32.xlu1 %v1077_v42  ;;  %vm1033_vm3 = vcmp.eq.f32.partialorder %v2476_v22, %v2471_v18  ;;  %vm1034_vm4 = vcmp.eq.f32.partialorder %v2476_v22, %v2474_v19  ;;  %v1080_v53 = vadd.f32 %v1701_v50, %v1700_v49 }
 0x347   :  { %v1093_v54 = vadd.f32 %v1707_v52, %v1706_v51  ;;  %v1704_v55 = vsel %vm1033_vm3, 1.0, %v1807_v21  ;;  %v1705_v56 = vsel %vm1034_vm4, 1.0, %v1807_v21  ;;  %vm1037_vm5 = vcmp.eq.f32.partialorder %v957_v36, %v2471_v18 }
 0x348   :  { %vm1038_vm6 = vcmp.eq.f32.partialorder %v957_v36, %v2474_v19  ;;  %v1090_v57 = vadd.f32 %v1705_v56, %v1704_v55  ;;  %v1708_v58 = vsel %vm1037_vm5, 1.0, %v1807_v21  ;;  %v1148_v18 = vrot.slane %v1143_v15, %v1862_v11 }
 0x349   :  { %v1709_v59 = vsel %vm1038_vm6, 1.0, %v1807_v21  ;;  %v1152_v19 = vrot.slane %v1143_v15, %v1864_v12  ;;  %v2617_v33 = vrot.slane %v1155_v28, %v1862_v11  ;;  %v2620_v34 = vrot.slane %v1155_v28, %v1864_v12 }
 0x34a   :  { %1075 = vadd.xlane.f32.xlu0 %v1074_v47  ;;  %1088 = vadd.xlane.f32.xlu1 %v1087_v48  ;;  %v1096_v60 = vadd.f32 %v1709_v59, %v1708_v58  ;;  %v1332_v50 = vrot.slane %v1327_v46, %v1862_v11 }
 0x34e   :  { %1081 = vadd.xlane.f32.xlu0 %v1080_v53  ;;  %1094 = vadd.xlane.f32.xlu1 %v1093_v54  ;;  %v1336_v54 = vrot.slane %v1327_v46, %v1864_v12 }
 0x352   :  { %1091 = vadd.xlane.f32.xlu0 %v1090_v57 }
 0x356   :  { %1097 = vadd.xlane.f32.xlu0 %v1096_v60 }
 0x35f   :  { %1125 = vperm.xlu1 %1805, %v1722_v61  }
 0x363   :  { %1135 = vperm.xlu1 %1805, %v1724_v62   ;;  %v1339_v62 = vld [vmem:[%s2857_s1] sm:$0x3] }
 0x367   :  { %1140 = vperm.xlu1 %1805, %v1725_v63  }
 0x36b   :  { %1314 = vperm.xlu1 %1805, %v1763_v0  }
 0x36c   :  { %1130 = vperm.xlu0 %1804, %v1723_v1  }
 0x36f   :  { %1324 = vperm.xlu1 %1805, %v1765_v2  }
 0x370   :  { %1309 = vperm.xlu0 %1804, %v1762_v3  }
 0x374   :  { %1319 = vperm.xlu0 %1804, %v1764_v4   ;;  %v2688_v4 = vrot.slane %v1339_v62, %v1862_v11 }
 0x3c7   :  { %v1060_v5 = vpop.xlane.xlu1 %1059  ;;  %v1057_v6 = vpop.xlane.xlu0 %1056 }
 0x3c8   :  { %1711 = vst.msk [vmem:[%s2858_s3 + $0xa8] sm:$0xff] %vm185_vm0, %v1060_v5  ;;  %1710 = vst.msk [vmem:[%s2858_s3 + $0xa0] sm:$0xff] %vm185_vm0, %v1057_v6 }
 0x3cb   :  { %v1073_v7 = vpop.xlane.xlu1 %1072  ;;  %v1063_v8 = vpop.xlane.xlu0 %1062 }
 0x3cc   :  { %1714 = vst.msk [vmem:[%s2859_s4 + $0xa0] sm:$0xff] %vm185_vm0, %v1073_v7  ;;  %1712 = vst.msk [vmem:[%s2858_s3 + $0xb0] sm:$0xff] %vm185_vm0, %v1063_v8  ;;  %v2692_v8 = vrot.slane %v1339_v62, %v1864_v12 }
 0x3cf   :  { %v1079_v9 = vpop.xlane.xlu1 %1078  ;;  %v1066_v10 = vpop.xlane.xlu0 %1065 }
 0x3d0   :  { %1716 = vst.msk [vmem:[%s2859_s4 + $0xb0] sm:$0xff] %vm185_vm0, %v1079_v9  ;;  %1713 = vst.msk [vmem:[%s2858_s3 + $0xb8] sm:$0xff] %vm185_vm0, %v1066_v10 }
 0x3d3   :  { %v1089_v13 = vpop.xlane.xlu1 %1088  ;;  %v1076_v14 = vpop.xlane.xlu0 %1075 }
 0x3d4   :  { %1718 = vst.msk [vmem:[%s2860_s5 + $0xa0] sm:$0xff] %vm185_vm0, %v1089_v13  ;;  %1715 = vst.msk [vmem:[%s2859_s4 + $0xa8] sm:$0xff] %vm185_vm0, %v1076_v14 }
 0x3d7   :  { %v1095_v16 = vpop.xlane.xlu1 %1094  ;;  %v1082_v17 = vpop.xlane.xlu0 %1081 }
 0x3d8   :  { %1720 = vst.msk [vmem:[%s2860_s5 + $0xb0] sm:$0xff] %vm185_vm0, %v1095_v16  ;;  %1717 = vst.msk [vmem:[%s2859_s4 + $0xb8] sm:$0xff] %vm185_vm0, %v1082_v17 }
 0x3db   :  { %v2593_v20 = vpop.permute.xlu1 %1125  ;;  %v1092_v22 = vpop.xlane.xlu0 %1091 }
 0x3dc   :  { %1719 = vst.msk [vmem:[%s2860_s5 + $0xa8] sm:$0xff] %vm185_vm0, %v1092_v22  ;;  %vm1167_vm7 = vcmp.gt.f32.partialorder %v2593_v20, %v1148_v18  ;;  %vm1168_vm8 = vcmp.gt.f32.partialorder %v2593_v20, %v1152_v19  ;;  %vm1191_vm15 = vcmp.gt.f32.partialorder %v2593_v20, %v2617_v33  ;;  %vm1192_vm1 = vcmp.gt.f32.partialorder %v2593_v20, %v2620_v34 }
 0x3dd   :  { %v1726_v23 = vsel %vm1167_vm7, 1.0, %v1807_v21  ;;  %v1727_v24 = vsel %vm1168_vm8, 1.0, %v1807_v21  ;;  %v1734_v45 = vsel %vm1191_vm15, 1.0, %v1807_v21  ;;  %v1735_v49 = vsel %vm1192_vm1, 1.0, %v1807_v21 }
 0x3de   :  { %v1239_v25 = vadd.f32 %v1727_v24, %v1726_v23  ;;  %v1255_v53 = vadd.f32 %v1735_v49, %v1734_v45 }
 0x3df   :  { %v2603_v26 = vpop.permute.xlu1 %1135  ;;  %v1098_v27 = vpop.xlane.xlu0 %1097 }
 0x3e0   :  { %1721 = vst.msk [vmem:[%s2860_s5 + $0xb8] sm:$0xff] %vm185_vm0, %v1098_v27  ;;  %1240 = vadd.xlane.f32.xlu0 %v1239_v25  ;;  %vm1171_vm9 = vcmp.gt.f32.partialorder %v2603_v26, %v1148_v18  ;;  %vm1172_vm10 = vcmp.gt.f32.partialorder %v2603_v26, %v1152_v19  ;;  %vm1195_vm6 = vcmp.gt.f32.partialorder %v2603_v26, %v2617_v33 }
 0x3e1   :  { %v1730_v29 = vsel %vm1171_vm9, 1.0, %v1807_v21  ;;  %v1731_v30 = vsel %vm1172_vm10, 1.0, %v1807_v21  ;;  %vm1196_vm9 = vcmp.gt.f32.partialorder %v2603_v26, %v2620_v34  ;;  %vm1215_vm10 = vcmp.eq.f32.partialorder %v2593_v20, %v2617_v33 }
 0x3e2   :  { %v1245_v31 = vadd.f32 %v1731_v30, %v1730_v29  ;;  %v1738_v57 = vsel %vm1195_vm6, 1.0, %v1807_v21  ;;  %v1739_v58 = vsel %vm1196_vm9, 1.0, %v1807_v21  ;;  %v1742_v61 = vsel %vm1215_vm10, 1.0, %v1807_v21 }
 0x3e3   :  { %v1141_v32 = vpop.permute.xlu1 %1140  ;;  %v1261_v60 = vadd.f32 %v1739_v58, %v1738_v57 }
 0x3e4   :  { %1246 = vadd.xlane.f32.xlu0 %v1245_v31  ;;  %vm1173_vm11 = vcmp.gt.f32.partialorder %v1141_v32, %v1148_v18  ;;  %vm1174_vm12 = vcmp.gt.f32.partialorder %v1141_v32, %v1152_v19  ;;  %vm1197_vm13 = vcmp.gt.f32.partialorder %v1141_v32, %v2617_v33  ;;  %vm1198_vm14 = vcmp.gt.f32.partialorder %v1141_v32, %v2620_v34 }
 0x3e5   :  { %v1732_v35 = vsel %vm1173_vm11, 1.0, %v1807_v21  ;;  %v1733_v36 = vsel %vm1174_vm12, 1.0, %v1807_v21  ;;  %v1740_v47 = vsel %vm1197_vm13, 1.0, %v1807_v21  ;;  %v1741_v48 = vsel %vm1198_vm14, 1.0, %v1807_v21 }
 0x3e6   :  { %v1248_v37 = vadd.f32 %v1733_v36, %v1732_v35  ;;  %v1264_v52 = vadd.f32 %v1741_v48, %v1740_v47  ;;  %vm1221_vm11 = vcmp.eq.f32.partialorder %v1141_v32, %v2617_v33  ;;  %vm1222_vm12 = vcmp.eq.f32.partialorder %v1141_v32, %v2620_v34 }
 0x3e7   :  { %v1131_v38 = vpop.permute.xlu0 %1130  ;;  %v2657_v51 = vpop.permute.xlu1 %1314  ;;  %vm1216_vm13 = vcmp.eq.f32.partialorder %v2593_v20, %v2620_v34  ;;  %v1748_v0 = vsel %vm1221_vm11, 1.0, %v1807_v21  ;;  %v1749_v1 = vsel %vm1222_vm12, 1.0, %v1807_v21  ;;  %vm1219_vm14 = vcmp.eq.f32.partialorder %v2603_v26, %v2617_v33 }
 0x3e8   :  { %1249 = vadd.xlane.f32.xlu0 %v1248_v37  ;;  %vm1193_vm2 = vcmp.gt.f32.partialorder %v1131_v38, %v2617_v33  ;;  %vm1194_vm3 = vcmp.gt.f32.partialorder %v1131_v38, %v2620_v34  ;;  %vm1169_vm4 = vcmp.gt.f32.partialorder %v1131_v38, %v1148_v18  ;;  %vm1170_vm5 = vcmp.gt.f32.partialorder %v1131_v38, %v1152_v19 }
 0x3e9   :  { %v1736_v39 = vsel %vm1193_vm2, 1.0, %v1807_v21  ;;  %v1737_v40 = vsel %vm1194_vm3, 1.0, %v1807_v21  ;;  %v1728_v41 = vsel %vm1169_vm4, 1.0, %v1807_v21  ;;  %v1729_v42 = vsel %vm1170_vm5, 1.0, %v1807_v21 }
 0x3ea   :  { %v1258_v43 = vadd.f32 %v1737_v40, %v1736_v39  ;;  %v1242_v44 = vadd.f32 %v1729_v42, %v1728_v41  ;;  %vm1217_vm7 = vcmp.eq.f32.partialorder %v1131_v38, %v2617_v33  ;;  %vm1218_vm8 = vcmp.eq.f32.partialorder %v1131_v38, %v2620_v34 }
 0x3eb   :  { %v1744_v55 = vsel %vm1217_vm7, 1.0, %v1807_v21  ;;  %v1745_v56 = vsel %vm1218_vm8, 1.0, %v1807_v21  ;;  %v2674_v63 = vpop.permute.xlu0 %1309  ;;  %v1743_v2 = vsel %vm1216_vm13, 1.0, %v1807_v21  ;;  %v2681_v3 = vpop.permute.xlu1 %1324  ;;  %vm1353_vm15 = vcmp.gt.f32.partialorder %v2657_v51, %v1332_v50 }
 0x3ec   :  { %1259 = vadd.xlane.f32.xlu0 %v1258_v43  ;;  %1243 = vadd.xlane.f32.xlu1 %v1242_v44  ;;  %v1274_v59 = vadd.f32 %v1745_v56, %v1744_v55  ;;  %vm1354_vm1 = vcmp.gt.f32.partialorder %v2657_v51, %v1336_v54  ;;  %vm1220_vm2 = vcmp.eq.f32.partialorder %v2603_v26, %v2620_v34  ;;  %v1746_v7 = vsel %vm1219_vm14, 1.0, %v1807_v21 }
 0x3ed   :  { %v1280_v5 = vadd.f32 %v1749_v1, %v1748_v0  ;;  %v1271_v6 = vadd.f32 %v1743_v2, %v1742_v61  ;;  %v1768_v9 = vsel %vm1353_vm15, 1.0, %v1807_v21  ;;  %v1769_v10 = vsel %vm1354_vm1, 1.0, %v1807_v21 }
 0x3ee   :  { %v1747_v13 = vsel %vm1220_vm2, 1.0, %v1807_v21  ;;  %vm1357_vm3 = vcmp.gt.f32.partialorder %v2681_v3, %v1332_v50  ;;  %vm1358_vm4 = vcmp.gt.f32.partialorder %v2681_v3, %v1336_v54  ;;  %vm1351_vm5 = vcmp.gt.f32.partialorder %v2674_v63, %v1332_v50 }
 0x3ef   :  { %vm1352_vm6 = vcmp.gt.f32.partialorder %v2674_v63, %v1336_v54  ;;  %v2701_v11 = vpop.permute.xlu0 %1319  ;;  %v1426_v12 = vadd.f32 %v1769_v10, %v1768_v9  ;;  %v1277_v14 = vadd.f32 %v1747_v13, %v1746_v7  ;;  %v1772_v15 = vsel %vm1357_vm3, 1.0, %v1807_v21 }
 0x3f0   :  { %1265 = vadd.xlane.f32.xlu0 %v1264_v52  ;;  %1256 = vadd.xlane.f32.xlu1 %v1255_v53  ;;  %v1773_v16 = vsel %vm1358_vm4, 1.0, %v1807_v21  ;;  %v1766_v17 = vsel %vm1351_vm5, 1.0, %v1807_v21  ;;  %v1767_v18 = vsel %vm1352_vm6, 1.0, %v1807_v21  ;;  %vm1377_vm7 = vcmp.gt.f32.partialorder %v2657_v51, %v2688_v4 }
 0x3f1   :  { %vm1378_vm8 = vcmp.gt.f32.partialorder %v2657_v51, %v2692_v8  ;;  %vm1355_vm9 = vcmp.gt.f32.partialorder %v2701_v11, %v1332_v50  ;;  %vm1356_vm10 = vcmp.gt.f32.partialorder %v2701_v11, %v1336_v54  ;;  %v1432_v19 = vadd.f32 %v1773_v16, %v1772_v15 }
 0x3f2   :  { %v1423_v20 = vadd.f32 %v1767_v18, %v1766_v17  ;;  %v1776_v22 = vsel %vm1377_vm7, 1.0, %v1807_v21  ;;  %v1777_v23 = vsel %vm1378_vm8, 1.0, %v1807_v21  ;;  %v1770_v24 = vsel %vm1355_vm9, 1.0, %v1807_v21 }
 0x3f3   :  { %v1771_v25 = vsel %vm1356_vm10, 1.0, %v1807_v21  ;;  %vm1381_vm11 = vcmp.gt.f32.partialorder %v2681_v3, %v2688_v4  ;;  %vm1382_vm12 = vcmp.gt.f32.partialorder %v2681_v3, %v2692_v8  ;;  %vm1375_vm13 = vcmp.gt.f32.partialorder %v2674_v63, %v2688_v4 }
 0x3f4   :  { %1275 = vadd.xlane.f32.xlu0 %v1274_v59  ;;  %1262 = vadd.xlane.f32.xlu1 %v1261_v60  ;;  %vm1376_vm14 = vcmp.gt.f32.partialorder %v2674_v63, %v2692_v8  ;;  %v1442_v26 = vadd.f32 %v1777_v23, %v1776_v22  ;;  %v1429_v27 = vadd.f32 %v1771_v25, %v1770_v24  ;;  %v1780_v28 = vsel %vm1381_vm11, 1.0, %v1807_v21 }
 0x3f5   :  { %v1781_v29 = vsel %vm1382_vm12, 1.0, %v1807_v21  ;;  %v1774_v30 = vsel %vm1375_vm13, 1.0, %v1807_v21  ;;  %v1775_v31 = vsel %vm1376_vm14, 1.0, %v1807_v21  ;;  %vm1401_vm15 = vcmp.eq.f32.partialorder %v2657_v51, %v2688_v4 }
 0x3f6   :  { %vm1402_vm1 = vcmp.eq.f32.partialorder %v2657_v51, %v2692_v8  ;;  %vm1379_vm2 = vcmp.gt.f32.partialorder %v2701_v11, %v2688_v4  ;;  %vm1380_vm3 = vcmp.gt.f32.partialorder %v2701_v11, %v2692_v8  ;;  %v1448_v32 = vadd.f32 %v1781_v29, %v1780_v28 }
 0x3f7   :  { %v1439_v33 = vadd.f32 %v1775_v31, %v1774_v30  ;;  %v1784_v34 = vsel %vm1401_vm15, 1.0, %v1807_v21  ;;  %v1785_v35 = vsel %vm1402_vm1, 1.0, %v1807_v21  ;;  %v1778_v36 = vsel %vm1379_vm2, 1.0, %v1807_v21 }
 0x3f8   :  { %1281 = vadd.xlane.f32.xlu0 %v1280_v5  ;;  %1272 = vadd.xlane.f32.xlu1 %v1271_v6  ;;  %v1779_v37 = vsel %vm1380_vm3, 1.0, %v1807_v21  ;;  %vm1405_vm4 = vcmp.eq.f32.partialorder %v2681_v3, %v2688_v4  ;;  %vm1406_vm5 = vcmp.eq.f32.partialorder %v2681_v3, %v2692_v8  ;;  %vm1399_vm6 = vcmp.eq.f32.partialorder %v2674_v63, %v2688_v4 }
 0x3f9   :  { %vm1400_vm7 = vcmp.eq.f32.partialorder %v2674_v63, %v2692_v8  ;;  %v1458_v38 = vadd.f32 %v1785_v35, %v1784_v34  ;;  %v1445_v39 = vadd.f32 %v1779_v37, %v1778_v36  ;;  %v1788_v40 = vsel %vm1405_vm4, 1.0, %v1807_v21 }
 0x3fa   :  { %v1789_v41 = vsel %vm1406_vm5, 1.0, %v1807_v21  ;;  %v1782_v42 = vsel %vm1399_vm6, 1.0, %v1807_v21  ;;  %v1783_v43 = vsel %vm1400_vm7, 1.0, %v1807_v21  ;;  %vm1403_vm8 = vcmp.eq.f32.partialorder %v2701_v11, %v2688_v4 }
 0x3fb   :  { %vm1404_vm9 = vcmp.eq.f32.partialorder %v2701_v11, %v2692_v8  ;;  %v1464_v44 = vadd.f32 %v1789_v41, %v1788_v40  ;;  %v1455_v45 = vadd.f32 %v1783_v43, %v1782_v42  ;;  %v1786_v46 = vsel %vm1403_vm8, 1.0, %v1807_v21 }
 0x3fc   :  { %1427 = vadd.xlane.f32.xlu0 %v1426_v12  ;;  %1278 = vadd.xlane.f32.xlu1 %v1277_v14  ;;  %v1787_v47 = vsel %vm1404_vm9, 1.0, %v1807_v21 }
 0x3fd   :  { %v1461_v48 = vadd.f32 %v1787_v47, %v1786_v46 }
 0x400   :  { %1433 = vadd.xlane.f32.xlu0 %v1432_v19  ;;  %1424 = vadd.xlane.f32.xlu1 %v1423_v20 }
 0x404   :  { %1443 = vadd.xlane.f32.xlu0 %v1442_v26  ;;  %1430 = vadd.xlane.f32.xlu1 %v1429_v27 }
 0x408   :  { %1449 = vadd.xlane.f32.xlu0 %v1448_v32  ;;  %1440 = vadd.xlane.f32.xlu1 %v1439_v33 }
 0x40c   :  { %1459 = vadd.xlane.f32.xlu0 %v1458_v38  ;;  %1446 = vadd.xlane.f32.xlu1 %v1445_v39 }
 0x410   :  { %1465 = vadd.xlane.f32.xlu0 %v1464_v44  ;;  %1456 = vadd.xlane.f32.xlu1 %v1455_v45 }
 0x414   :  { %1462 = vadd.xlane.f32.xlu1 %v1461_v48 }
 0x469   :  { %v1241_v49 = vpop.xlane.xlu0 %1240 }
 0x46a   :  { %1750 = vst.msk [vmem:[%s2858_s3 + $0xc0] sm:$0xff] %vm185_vm0, %v1241_v49 }
 0x46d   :  { %v1247_v50 = vpop.xlane.xlu0 %1246 }
 0x46e   :  { %1752 = vst.msk [vmem:[%s2858_s3 + $0xd0] sm:$0xff] %vm185_vm0, %v1247_v50 }
 0x471   :  { %v1250_v51 = vpop.xlane.xlu0 %1249 }
 0x472   :  { %1753 = vst.msk [vmem:[%s2858_s3 + $0xd8] sm:$0xff] %vm185_vm0, %v1250_v51 }
 0x475   :  { %v1244_v21 = vpop.xlane.xlu1 %1243  ;;  %v1260_v52 = vpop.xlane.xlu0 %1259 }
 0x476   :  { %1751 = vst.msk [vmem:[%s2858_s3 + $0xc8] sm:$0xff] %vm185_vm0, %v1244_v21  ;;  %1755 = vst.msk [vmem:[%s2859_s4 + $0xc8] sm:$0xff] %vm185_vm0, %v1260_v52 }
 0x479   :  { %v1257_v53 = vpop.xlane.xlu1 %1256  ;;  %v1266_v54 = vpop.xlane.xlu0 %1265 }
 0x47a   :  { %1754 = vst.msk [vmem:[%s2859_s4 + $0xc0] sm:$0xff] %vm185_vm0, %v1257_v53  ;;  %1757 = vst.msk [vmem:[%s2859_s4 + $0xd8] sm:$0xff] %vm185_vm0, %v1266_v54 }
 0x47d   :  { %v1263_v55 = vpop.xlane.xlu1 %1262  ;;  %v1276_v56 = vpop.xlane.xlu0 %1275 }
 0x47e   :  { %1756 = vst.msk [vmem:[%s2859_s4 + $0xd0] sm:$0xff] %vm185_vm0, %v1263_v55  ;;  %1759 = vst.msk [vmem:[%s2860_s5 + $0xc8] sm:$0xff] %vm185_vm0, %v1276_v56 }
 0x481   :  { %v1273_v57 = vpop.xlane.xlu1 %1272  ;;  %v1282_v58 = vpop.xlane.xlu0 %1281 }
 0x482   :  { %1758 = vst.msk [vmem:[%s2860_s5 + $0xc0] sm:$0xff] %vm185_vm0, %v1273_v57  ;;  %1761 = vst.msk [vmem:[%s2860_s5 + $0xd8] sm:$0xff] %vm185_vm0, %v1282_v58 }
 0x485   :  { %v1279_v59 = vpop.xlane.xlu1 %1278  ;;  %v1428_v60 = vpop.xlane.xlu0 %1427 }
 0x486   :  { %1760 = vst.msk [vmem:[%s2860_s5 + $0xd0] sm:$0xff] %vm185_vm0, %v1279_v59  ;;  %1791 = vst.msk [vmem:[%s2858_s3 + $0xe8] sm:$0xff] %vm185_vm0, %v1428_v60 }
 0x489   :  { %v1425_v61 = vpop.xlane.xlu1 %1424  ;;  %v1434_v62 = vpop.xlane.xlu0 %1433 }
 0x48a   :  { %1790 = vst.msk [vmem:[%s2858_s3 + $0xe0] sm:$0xff] %vm185_vm0, %v1425_v61  ;;  %1793 = vst.msk [vmem:[%s2858_s3 + $0xf8] sm:$0xff] %vm185_vm0, %v1434_v62 }
 0x48d   :  { %v1431_v63 = vpop.xlane.xlu1 %1430  ;;  %v1444_v0 = vpop.xlane.xlu0 %1443 }
 0x48e   :  { %1792 = vst.msk [vmem:[%s2858_s3 + $0xf0] sm:$0xff] %vm185_vm0, %v1431_v63  ;;  %1795 = vst.msk [vmem:[%s2859_s4 + $0xe8] sm:$0xff] %vm185_vm0, %v1444_v0 }
 0x491   :  { %v1441_v1 = vpop.xlane.xlu1 %1440  ;;  %v1450_v2 = vpop.xlane.xlu0 %1449 }
 0x492   :  { %1794 = vst.msk [vmem:[%s2859_s4 + $0xe0] sm:$0xff] %vm185_vm0, %v1441_v1  ;;  %1797 = vst.msk [vmem:[%s2859_s4 + $0xf8] sm:$0xff] %vm185_vm0, %v1450_v2 }
 0x495   :  { %v1447_v3 = vpop.xlane.xlu1 %1446  ;;  %v1460_v4 = vpop.xlane.xlu0 %1459 }
 0x496   :  { %1796 = vst.msk [vmem:[%s2859_s4 + $0xf0] sm:$0xff] %vm185_vm0, %v1447_v3  ;;  %1799 = vst.msk [vmem:[%s2860_s5 + $0xe8] sm:$0xff] %vm185_vm0, %v1460_v4 }
 0x499   :  { %v1457_v5 = vpop.xlane.xlu1 %1456  ;;  %v1466_v6 = vpop.xlane.xlu0 %1465 }
 0x49a   :  { %1798 = vst.msk [vmem:[%s2860_s5 + $0xe0] sm:$0xff] %vm185_vm0, %v1457_v5  ;;  %1801 = vst.msk [vmem:[%s2860_s5 + $0xf8] sm:$0xff] %vm185_vm0, %v1466_v6 }
 0x49d   :  { %v1463_v7 = vpop.xlane.xlu1 %1462 }
 0x49e   :  { %1800 = vst.msk [vmem:[%s2860_s5 + $0xf0] sm:$0xff] %vm185_vm0, %v1463_v7 }

</bundles_post_ra>
